<compile_context>
chip_gen: v7x
topology: tpu7x:2x2x1
jax: 0.10.0
libtpu: 0.0.40
codegen_flags: <defaults>
</compile_context>

<pallas_src>
import math
from functools import partial

import numpy as np
import jax
import jax.numpy as jnp
from jax.experimental import pallas as pl
from jax.experimental.pallas import tpu as pltpu

ACT_DTYPE = jnp.bfloat16          # inter-layer activation dtype (fp32 accumulation in-kernel)


def _round_up(x: int, m: int) -> int:
    return (x + m - 1) // m * m


def _vmem_limit_bytes() -> int:
    """Generation-aware VMEM budget (v5e/v6e: 128 MiB physical, v7x: 64 MiB)."""
    try:
        cap = int(pltpu.get_tpu_info().vmem_capacity_bytes)
    except Exception:
        cap = 64 * 1024 * 1024
    return int(min(cap * 3 // 4, 96 * 1024 * 1024))


_VMEM_LIMIT = _vmem_limit_bytes()


# ----------------------------------------------------------------------------
# pltpu.roll direction probe (one tiny kernel, run once at import): makes the
# conv kernel robust to the roll sign convention instead of silently mis-shifting.
# ----------------------------------------------------------------------------

def _roll_probe_kernel(x_ref, o_ref):
    o_ref[...] = pltpu.roll(x_ref[...], 1, 0)


def _detect_roll_sign() -> int:
    x = jnp.arange(8, dtype=jnp.float32).reshape(8, 1) * jnp.ones((1, 128), jnp.float32)
    y = pl.pallas_call(
        _roll_probe_kernel,
        out_shape=jax.ShapeDtypeStruct((8, 128), jnp.float32),
    )(x)
    # jnp.roll convention: out[i] = in[i - shift]  ->  y[1, 0] == 0.
    return -1 if abs(float(y[1, 0])) < 0.5 else 1


try:
    _ROLL_SIGN = _detect_roll_sign()
except Exception:       # conservative default: jnp.roll convention
    _ROLL_SIGN = -1


# ----------------------------------------------------------------------------
# Fused conv matmul kernel: out = act( sum_t roll(x @ w[t], rolls[t]) + b ) [* ring mask]
# Used for 3x3 convs (9 taps over the flat-padded layout) and 1x1 convs (single tap).
# ----------------------------------------------------------------------------

def _conv_kernel(x_ref, w_ref, b_ref, *rest, rolls, relu, has_mask):
    if has_mask:
        mask_ref, o_ref, acc_ref = rest
    else:
        mask_ref = None
        o_ref, acc_ref = rest

    k = pl.program_id(2)

    @pl.when(k == 0)
    def _():
        acc_ref[...] = jnp.zeros_like(acc_ref)

    xv = x_ref[0]                                            # (M, bk) bf16
    part = None
    for t, amt in enumerate(rolls):
        p = jnp.dot(xv, w_ref[t], preferred_element_type=jnp.float32)
        if amt:
            p = pltpu.roll(p, amt, 0)                        # align tap rows to output rows
        part = p if part is None else part + p
    acc_ref[...] += part

    @pl.when(k == pl.num_programs(2) - 1)
    def _():
        res = acc_ref[...] + b_ref[...]
        if relu:
            res = jnp.maximum(res, 0.0)
        if has_mask:
            res = res * mask_ref[...]                        # zero the padding-ring rows
        o_ref[0] = res.astype(o_ref.dtype)


def conv_matmul(x, w, b, mask, *, rolls, relu, out_dtype):
    """x:(N,M,Cin) bf16, w:(T,Cin,Cout) bf16, b:(1,Cout) f32, mask:(M,1) f32 or None."""
    N, M, Cin = x.shape
    T, _, Cout = w.shape
    assert T == len(rolls)
    bk = Cin if Cin <= 512 else 512        # all channel counts here divide these cleanly
    bn = Cout if Cout <= 256 else 256
    assert Cin % bk == 0 and Cout % bn == 0
    grid = (N, Cout // bn, Cin // bk)      # batch axis parallel -> both v7x TCs busy

    in_specs = [
        pl.BlockSpec((1, M, bk), lambda n, j, k: (n, 0, k)),
        pl.BlockSpec((T, bk, bn), lambda n, j, k: (0, k, j)),
        pl.BlockSpec((1, bn), lambda n, j, k: (0, j)),
    ]
    inputs = [x, w, b]
    if mask is not None:
        in_specs.append(pl.BlockSpec((M, 1), lambda n, j, k: (0, 0)))
        inputs.append(mask)

    return pl.pallas_call(
        partial(_conv_kernel, rolls=tuple(rolls), relu=relu, has_mask=mask is not None),
        out_shape=jax.ShapeDtypeStruct((N, M, Cout), out_dtype),
        grid_spec=pltpu.PrefetchScalarGridSpec(
            num_scalar_prefetch=0,
            grid=grid,
            in_specs=in_specs,
            out_specs=pl.BlockSpec((1, M, bn), lambda n, j, k: (n, 0, j)),
            scratch_shapes=[pltpu.VMEM((M, bn), jnp.float32)],
        ),
        compiler_params=pltpu.CompilerParams(
            dimension_semantics=("parallel", "parallel", "arbitrary"),
            vmem_limit_bytes=_VMEM_LIMIT),
    )(*inputs)


# ----------------------------------------------------------------------------
# Flat-padded activation layout helpers (zero ring around the image, spatial flattened)
# ----------------------------------------------------------------------------

def _flat_padded(x):
    """NHWC -> zero-ring flat-padded (N, round_up((H+2)*(W+2), 8), C)."""
    N, H, W, C = x.shape
    Mp = (H + 2) * (W + 2)
    xf = jnp.pad(x, ((0, 0), (1, 1), (1, 1), (0, 0))).reshape(N, Mp, C)
    pad = _round_up(Mp, 8) - Mp
    if pad:
        xf = jnp.pad(xf, ((0, 0), (0, pad), (0, 0)))
    return xf


def _unflatten(xf, H, W):
    """flat-padded -> plain NHWC."""
    N, C = xf.shape[0], xf.shape[-1]
    Mp = (H + 2) * (W + 2)
    return xf[:, :Mp, :].reshape(N, H + 2, W + 2, C)[:, 1:H + 1, 1:W + 1, :]


def _ring_mask(H, W):
    Mp = (H + 2) * (W + 2)
    m = np.zeros((_round_up(Mp, 8), 1), np.float32)
    grid = np.zeros((H + 2, W + 2), np.float32)
    grid[1:H + 1, 1:W + 1] = 1.0
    m[:Mp, 0] = grid.reshape(-1)
    return jnp.asarray(m)


def conv3x3_flat(xf, w3, b, H, W, *, relu=True):
    """3x3 conv (padding=1, stride=1) on the flat-padded layout; output stays flat-padded."""
    Wp = W + 2
    Mrows = xf.shape[1]
    offs = [(dy - 1) * Wp + (dx - 1) for dy in range(3) for dx in range(3)]
    rolls = tuple((_ROLL_SIGN * o) % Mrows if o else 0 for o in offs)
    return conv_matmul(xf, w3, b, _ring_mask(H, W),
                       rolls=rolls, relu=relu, out_dtype=ACT_DTYPE)


def conv1x1(x, w1, b, *, relu, out_dtype=ACT_DTYPE):
    N, H, W, C = x.shape
    y = conv_matmul(x.reshape(N, H * W, C), w1, b, None,
                    rolls=(0,), relu=relu, out_dtype=out_dtype)
    return y.reshape(N, H, W, -1)


def conv_block(x, p):
    """Two (3x3 conv -> ReLU) layers (normalization=None -> Identity)."""
    N, H, W, _ = x.shape
    xf = _flat_padded(x)
    xf = conv3x3_flat(xf, p["w1"], p["b1"], H, W, relu=True)
    xf = conv3x3_flat(xf, p["w2"], p["b2"], H, W, relu=True)
    return _unflatten(xf, H, W)


# ----------------------------------------------------------------------------
# 2x2 max pool, stride 2 (tiled, gather done in-kernel from one contiguous block)
# ----------------------------------------------------------------------------

def _pool_kernel(x_ref, o_ref, *, C):
    xv = x_ref[0]                            # (bh, 2, Wo, 2C): (out rows, row pair, out cols, col pair*C)
    m = jnp.maximum(xv[:, 0], xv[:, 1])      # max over the row pair      -> (bh, Wo, 2C)
    ms = pltpu.roll(m, C, 2)                 # bring the odd column's channels to lanes [0,C)
    o_ref[0] = jnp.maximum(m, ms)[:, :, :C]  # max over the column pair   -> (bh, Wo, C)


def maxpool2x2(x):
    N, H, W, C = x.shape
    Ho, Wo = H // 2, W // 2
    xr = x.reshape(N, Ho, 2, Wo, 2 * C)      # contiguity-preserving (free) reshape
    cap = max(1, (2 * 1024 * 1024) // max(1, 2 * Wo * 2 * C * x.dtype.itemsize))
    bh = 1
    for d in range(1, Ho + 1):               # largest divisor of Ho under the VMEM cap
        if Ho % d == 0 and d <= cap:
            bh = d
    return pl.pallas_call(
        partial(_pool_kernel, C=C),
        out_shape=jax.ShapeDtypeStruct((N, Ho, Wo, C), x.dtype),
        grid_spec=pltpu.PrefetchScalarGridSpec(
            num_scalar_prefetch=0,
            grid=(N, Ho // bh),
            in_specs=[pl.BlockSpec((1, bh, 2, Wo, 2 * C), lambda n, i: (n, i, 0, 0, 0))],
            out_specs=pl.BlockSpec((1, bh, Wo, C), lambda n, i: (n, i, 0, 0)),
        ),
        compiler_params=pltpu.CompilerParams(
            dimension_semantics=("parallel", "arbitrary"),
            vmem_limit_bytes=_VMEM_LIMIT),
    )(xr)


# ----------------------------------------------------------------------------
# Bilinear x2 upsampling, align_corners=True (matches nn.Upsample in the module)
# ----------------------------------------------------------------------------

def _interp_matrix_np(n_in: int) -> np.ndarray:
    """(2*n_in, n_in) bilinear x2 interpolation matrix, align_corners=True."""
    n_out = 2 * n_in
    if n_in == 1:
        return np.ones((n_out, 1), np.float32)
    src = np.arange(n_out) * (n_in - 1) / (n_out - 1)
    i0 = np.minimum(np.floor(src).astype(np.int64), n_in - 1)
    i1 = np.minimum(i0 + 1, n_in - 1)
    f = (src - i0).astype(np.float32)
    M = np.zeros((n_out, n_in), np.float32)
    M[np.arange(n_out), i0] += 1.0 - f
    M[np.arange(n_out), i1] += f
    return M


def _upsample_kernel(iy_ref, x0_ref, x1_ref, mw_ref, o_ref, *, h):
    yo = pl.program_id(1)
    i0 = iy_ref[yo, 0]
    scale = float(h - 1) / float(2 * h - 1)
    w1 = yo.astype(jnp.float32) * scale - i0.astype(jnp.float32)
    w0 = 1.0 - w1
    r0 = x0_ref[0, 0].astype(jnp.float32)            # (w, C) source row floor
    r1 = x1_ref[0, 0].astype(jnp.float32)            # (w, C) source row ceil
    row = w0 * r0 + w1 * r1                          # height lerp (VPU)
    o_ref[0, 0] = jnp.dot(mw_ref[...], row,          # width lerp as one tiny matmul
                          preferred_element_type=jnp.float32).astype(o_ref.dtype)


def upsample_bilinear2x(x):
    N, h, w, C = x.shape
    ho, wo = 2 * h, 2 * w
    if h == 1:
        iy = np.zeros((ho, 2), np.int32)
    else:
        src = np.arange(ho) * (h - 1) / (ho - 1)
        i0 = np.minimum(np.floor(src).astype(np.int64), h - 1)
        i1 = np.minimum(i0 + 1, h - 1)
        iy = np.stack([i0, i1], axis=1).astype(np.int32)
    iy = jnp.asarray(iy)
    mw = jnp.asarray(_interp_matrix_np(w))

    return pl.pallas_call(
        partial(_upsample_kernel, h=h),
        out_shape=jax.ShapeDtypeStruct((N, ho, wo, C), x.dtype),
        grid_spec=pltpu.PrefetchScalarGridSpec(
            num_scalar_prefetch=1,                    # iy: source-row indices (SMEM)
            grid=(N, ho),
            in_specs=[
                pl.BlockSpec((1, 1, w, C), lambda n, yo, iy_r: (n, iy_r[yo, 0], 0, 0)),
                pl.BlockSpec((1, 1, w, C), lambda n, yo, iy_r: (n, iy_r[yo, 1], 0, 0)),
                pl.BlockSpec((wo, w), lambda n, yo, iy_r: (0, 0)),
            ],
            out_specs=pl.BlockSpec((1, 1, wo, C), lambda n, yo, iy_r: (n, yo, 0, 0)),
        ),
        compiler_params=pltpu.CompilerParams(
            dimension_semantics=("parallel", "arbitrary"),
            vmem_limit_bytes=_VMEM_LIMIT),
    )(iy, x, x, mw)


# ----------------------------------------------------------------------------
# UNet parameters (weights pre-packed once into kernel-ready bf16 matrices)
# ----------------------------------------------------------------------------

def _kaiming(key, cout, cin, k):
    fan_in = cin * k * k
    std = math.sqrt(2.0 / fan_in)                     # kaiming_normal_ (fan_in, ReLU gain)
    return jax.random.normal(key, (cout, cin, k, k), jnp.float32) * std


def _conv3x3_params(key, cin, cout):
    w = _kaiming(key, cout, cin, 3)
    w3 = jnp.transpose(w, (2, 3, 1, 0)).reshape(9, cin, cout).astype(ACT_DTYPE)
    return w3, jnp.zeros((1, cout), jnp.float32)      # nn.init.constant_(bias, 0)


def _conv1x1_params(key, cin, cout):
    w = _kaiming(key, cout, cin, 1)
    w1 = jnp.transpose(w, (2, 3, 1, 0)).reshape(1, cin, cout).astype(ACT_DTYPE)
    return w1, jnp.zeros((1, cout), jnp.float32)


def _conv_block_params(key, cin, cout):
    k1, k2 = jax.random.split(key)
    w1, b1 = _conv3x3_params(k1, cin, cout)
    w2, b2 = _conv3x3_params(k2, cout, cout)
    return {"w1": w1, "b1": b1, "w2": w2, "b2": b2}


def init_unet_params(key, in_channels, out_channels):
    ch = [64 * 2 ** i for i in range(5)]
    keys = jax.random.split(key, 10)
    params = {"first": _conv_block_params(keys[0], in_channels, ch[0]),
              "contract": [], "expand": []}
    for i in range(4):
        params["contract"].append(_conv_block_params(keys[1 + i], ch[i], ch[i + 1]))
    for i in range(4):                                # forward order: expansion4, 3, 2, 1
        cin, cout = ch[4 - i], ch[3 - i]
        kup, kcb = jax.random.split(keys[5 + i])
        uw, ub = _conv1x1_params(kup, cin, cout)
        params["expand"].append({"up_w": uw, "up_b": ub,
                                 "cb": _conv_block_params(kcb, cin, cout)})
    lw, lb = _conv1x1_params(keys[9], ch[0], out_channels)
    params["last_w"], params["last_b"] = lw, lb
    return params


# ----------------------------------------------------------------------------
# Forward pass
# ----------------------------------------------------------------------------

def expansion(large, small, p):
    x = upsample_bilinear2x(small)                    # bilinear x2
    x = conv1x1(x, p["up_w"], p["up_b"], relu=True)   # 1x1 conv + ReLU (norm=Identity)
    # pad=True: zero-pad up to the skip's spatial size (no-op for even input sizes)
    dh = large.shape[1] - x.shape[1]
    dw = large.shape[2] - x.shape[2]
    if dh > 0 or dw > 0:
        x = jnp.pad(x, ((0, 0), (dh // 2, dh - dh // 2),
                        (dw // 2, dw - dw // 2), (0, 0)))
    # copy_and_crop: center-crop skip to x's size, concat along channels
    sh, sw = x.shape[1], x.shape[2]
    sx = (large.shape[1] - sh) // 2
    sy = (large.shape[2] - sw) // 2
    cropped = large[:, sx:sx + sh, sy:sy + sw, :]
    # TODO(synk): fuse this concat into the first decoder conv's Cin grid axis
    # (two K-partial accumulations) to avoid materializing the concatenated tensor.
    cat = jnp.concatenate([cropped, x], axis=-1)
    return conv_block(cat, p["cb"])


@jax.jit
def unet_forward(params, x_nchw):
    x = jnp.transpose(x_nchw, (0, 2, 3, 1)).astype(ACT_DTYPE)   # NCHW -> NHWC bf16
    x1 = conv_block(x, params["first"])
    skips = [x1]
    h = x1
    for cp in params["contract"]:
        h = maxpool2x2(h)
        h = conv_block(h, cp)
        skips.append(h)
    h = skips[4]
    for i, ep in enumerate(params["expand"]):
        h = expansion(skips[3 - i], h, ep)
    h = conv1x1(h, params["last_w"], params["last_b"], relu=False,
                out_dtype=jnp.float32)
    return jnp.transpose(h, (0, 3, 1, 2))                       # NHWC -> NCHW


# ----------------------------------------------------------------------------
# Lightweight numerical self-checks of the three kernels vs. pure-JAX references
# (generous tolerances; only structural bugs would trip them).
# ----------------------------------------------------------------------------

def _reference_conv3x3(x32, w_oihw, b, relu):
    y = jax.lax.conv_general_dilated(
        x32, w_oihw, window_strides=(1, 1), padding="SAME",
        dimension_numbers=("NHWC", "OIHW", "NHWC"))
    y = y + b.reshape(1, 1, 1, -1)
    return jnp.maximum(y, 0.0) if relu else y


def _self_check(key):
    k1, k2 = jax.random.split(key)
    # 3x3 conv + bias + relu
    N, H, W, Ci, Co = 2, 8, 8, 8, 16
    x = jax.random.normal(k1, (N, H, W, Ci), jnp.float32).astype(ACT_DTYPE)
    w = (jax.random.normal(k2, (Co, Ci, 3, 3), jnp.float32) * 0.2).astype(ACT_DTYPE)
    b = jnp.linspace(-0.5, 0.5, Co, dtype=jnp.float32).reshape(1, Co)
    w3 = jnp.transpose(w, (2, 3, 1, 0)).reshape(9, Ci, Co)
    y = _unflatten(conv3x3_flat(_flat_padded(x), w3, b, H, W, relu=True), H, W)
    ref = _reference_conv3x3(x.astype(jnp.float32), w.astype(jnp.float32), b, True)
    err = float(jnp.max(jnp.abs(y.astype(jnp.float32) - ref)))
    assert err < 0.25, f"conv3x3 self-check failed (max err {err})"
    # 2x2 max pool
    xp = jax.random.normal(k1, (2, 8, 8, 128), jnp.float32).astype(ACT_DTYPE)
    yp = maxpool2x2(xp).astype(jnp.float32)
    refp = jnp.max(xp.astype(jnp.float32).reshape(2, 4, 2, 4, 2, 128), axis=(2, 4))
    errp = float(jnp.max(jnp.abs(yp - refp)))
    assert errp < 1e-5, f"maxpool self-check failed (max err {errp})"
    # bilinear x2 upsample (align_corners=True)
    xu = jax.random.normal(k2, (2, 4, 4, 128), jnp.float32).astype(ACT_DTYPE)
    yu = upsample_bilinear2x(xu).astype(jnp.float32)
    m = jnp.asarray(_interp_matrix_np(4))
    refu = jnp.einsum("ai,nijc,bj->nabc", m, xu.astype(jnp.float32), m)
    erru = float(jnp.max(jnp.abs(yu - refu)))
    assert erru < 0.05, f"upsample self-check failed (max err {erru})"


# ----------------------------------------------------------------------------

if __name__ == "__main__":
    key = jax.random.PRNGKey(0)
    pkey, xkey, ckey = jax.random.split(key, 3)

    _self_check(ckey)

    IN_CH, OUT_CH = 3, 2
    params = init_unet_params(pkey, IN_CH, OUT_CH)

    # Small input (spatial must be divisible by 16 for the 4 max-pool stages).
    x = jax.random.normal(xkey, (2, IN_CH, 16, 16), jnp.float32)   # NCHW like PyTorch

    y = unet_forward(params, x)
    jax.block_until_ready(y)
    assert y.shape == (2, OUT_CH, 16, 16), y.shape
    assert bool(jnp.all(jnp.isfinite(y)))
    print("KERNEL_OK")
</pallas_src>

<mosaic_0001>
module attributes {stable_mosaic.version = 11 : i64} {
  func.func @_roll_probe_kernel(%arg0: memref<8x128xf32, #tpu.memory_space<vmem>>, %arg1: memref<8x128xf32, #tpu.memory_space<vmem>>) attributes {dimension_semantics = [], scalar_prefetch = 0 : i64, scratch_operands = 0 : i64, tpu.core_type = #tpu.core_type<tc>} {
    %c0 = arith.constant 0 : index
    %c0_0 = arith.constant 0 : index
    %0 = vector.load %arg0[%c0, %c0_0] : memref<8x128xf32, #tpu.memory_space<vmem>>, vector<8x128xf32>
    %c1_i32 = arith.constant 1 : i32
    %1 = tpu.dynamic_rotate %0 by %c1_i32 dim 0 : vector<8x128xf32>, i32 -> vector<8x128xf32>
    %c0_1 = arith.constant 0 : index
    %c0_2 = arith.constant 0 : index
    %2 = vector.load %arg1[%c0_1, %c0_2] : memref<8x128xf32, #tpu.memory_space<vmem>>, vector<8x128xf32>
    tpu.vector_store %arg1[%c0_1, %c0_2], %1 {strides = array<i32>} : memref<8x128xf32, #tpu.memory_space<vmem>>, vector<8x128xf32>,
    return
  }
}

module attributes {stable_mosaic.version = 11 : i64} {
  func.func @_conv_kernel(%arg0: i32, %arg1: i32, %arg2: i32, %arg3: memref<1x104x8xbf16, #tpu.memory_space<vmem>>, %arg4: memref<9x8x16xbf16, #tpu.memory_space<vmem>>, %arg5: memref<1x16xf32, #tpu.memory_space<vmem>>, %arg6: memref<104x1xf32, #tpu.memory_space<vmem>>, %arg7: memref<1x104x16xbf16, #tpu.memory_space<vmem>>, %arg8: memref<104x16xf32, #tpu.memory_space<vmem>>) attributes {dimension_semantics = [#tpu.dimension_semantics<parallel>, #tpu.dimension_semantics<parallel>, #tpu.dimension_semantics<arbitrary>], iteration_bounds = array<i64: 2, 1, 1>, scalar_prefetch = 0 : i64, scratch_operands = 1 : i64, tpu.core_type = #tpu.core_type<tc>, window_params = [{transform_indices = @transform_0, window_bounds = array<i64: 1, 104, 8>}, {transform_indices = @transform_1, window_bounds = array<i64: 9, 8, 16>}, {transform_indices = @transform_2, window_bounds = array<i64: 1, 16>}, {pipeline_mode = #tpu.pipeline_mode<synchronous>, transform_indices = @transform_3, window_bounds = array<i64: 104, 1>}, {transform_indices = @transform_4, window_bounds = array<i64: 1, 104, 16>}]} {
    %c0_i32 = arith.constant 0 : i32
    %0 = arith.cmpi eq, %arg2, %c0_i32 : i32
    %1 = arith.extui %0 : i1 to i32
    %c0_i32_0 = arith.constant 0 : i32
    %2 = arith.cmpi ne, %1, %c0_i32_0 : i32
    scf.if %2 {
      %cst_36 = arith.constant 0.000000e+00 : f32
      %54 = vector.broadcast %cst_36 : f32 to vector<104x16xf32>
      %c0_37 = arith.constant 0 : index
      %c0_38 = arith.constant 0 : index
      %55 = vector.load %arg8[%c0_37, %c0_38] : memref<104x16xf32, #tpu.memory_space<vmem>>, vector<104x16xf32>
      tpu.vector_store %arg8[%c0_37, %c0_38], %54 {strides = array<i32>} : memref<104x16xf32, #tpu.memory_space<vmem>>, vector<104x16xf32>,
    } else {
    }
    %c0 = arith.constant 0 : index
    %c0_1 = arith.constant 0 : index
    %c0_2 = arith.constant 0 : index
    %3 = vector.load %arg3[%c0, %c0_1, %c0_2] : memref<1x104x8xbf16, #tpu.memory_space<vmem>>, vector<1x104x8xbf16>
    %4 = vector.shape_cast %3 : vector<1x104x8xbf16> to vector<104x8xbf16>
    %c0_3 = arith.constant 0 : index
    %c0_4 = arith.constant 0 : index
    %c0_5 = arith.constant 0 : index
    %5 = vector.load %arg4[%c0_3, %c0_4, %c0_5] : memref<9x8x16xbf16, #tpu.memory_space<vmem>>, vector<1x8x16xbf16>
    %6 = vector.shape_cast %5 : vector<1x8x16xbf16> to vector<8x16xbf16>
    %cst = arith.constant dense<0.000000e+00> : vector<104x16xf32>
    %7 = tpu.matmul %4, %6, %cst {dimension_numbers = #tpu.dot_dimension_numbers<[1], [0], [0], [1], [0, 0, 1, 1], [], []>} : vector<104x8xbf16>, vector<8x16xbf16>, vector<104x16xf32> -> vector<104x16xf32>
    %c11_i32 = arith.constant 11 : i32
    %8 = tpu.dynamic_rotate %7 by %c11_i32 dim 0 : vector<104x16xf32>, i32 -> vector<104x16xf32>
    %c1 = arith.constant 1 : index
    %c0_6 = arith.constant 0 : index
    %c0_7 = arith.constant 0 : index
    %9 = vector.load %arg4[%c1, %c0_6, %c0_7] : memref<9x8x16xbf16, #tpu.memory_space<vmem>>, vector<1x8x16xbf16>
    %10 = vector.shape_cast %9 : vector<1x8x16xbf16> to vector<8x16xbf16>
    %cst_8 = arith.constant dense<0.000000e+00> : vector<104x16xf32>
    %11 = tpu.matmul %4, %10, %cst_8 {dimension_numbers = #tpu.dot_dimension_numbers<[1], [0], [0], [1], [0, 0, 1, 1], [], []>} : vector<104x8xbf16>, vector<8x16xbf16>, vector<104x16xf32> -> vector<104x16xf32>
    %c10_i32 = arith.constant 10 : i32
    %12 = tpu.dynamic_rotate %11 by %c10_i32 dim 0 : vector<104x16xf32>, i32 -> vector<104x16xf32>
    %13 = arith.addf %8, %12 : vector<104x16xf32>
    %c2 = arith.constant 2 : index
    %c0_9 = arith.constant 0 : index
    %c0_10 = arith.constant 0 : index
    %14 = vector.load %arg4[%c2, %c0_9, %c0_10] : memref<9x8x16xbf16, #tpu.memory_space<vmem>>, vector<1x8x16xbf16>
    %15 = vector.shape_cast %14 : vector<1x8x16xbf16> to vector<8x16xbf16>
    %cst_11 = arith.constant dense<0.000000e+00> : vector<104x16xf32>
    %16 = tpu.matmul %4, %15, %cst_11 {dimension_numbers = #tpu.dot_dimension_numbers<[1], [0], [0], [1], [0, 0, 1, 1], [], []>} : vector<104x8xbf16>, vector<8x16xbf16>, vector<104x16xf32> -> vector<104x16xf32>
    %c9_i32 = arith.constant 9 : i32
    %17 = tpu.dynamic_rotate %16 by %c9_i32 dim 0 : vector<104x16xf32>, i32 -> vector<104x16xf32>
    %18 = arith.addf %13, %17 : vector<104x16xf32>
    %c3 = arith.constant 3 : index
    %c0_12 = arith.constant 0 : index
    %c0_13 = arith.constant 0 : index
    %19 = vector.load %arg4[%c3, %c0_12, %c0_13] : memref<9x8x16xbf16, #tpu.memory_space<vmem>>, vector<1x8x16xbf16>
    %20 = vector.shape_cast %19 : vector<1x8x16xbf16> to vector<8x16xbf16>
    %cst_14 = arith.constant dense<0.000000e+00> : vector<104x16xf32>
    %21 = tpu.matmul %4, %20, %cst_14 {dimension_numbers = #tpu.dot_dimension_numbers<[1], [0], [0], [1], [0, 0, 1, 1], [], []>} : vector<104x8xbf16>, vector<8x16xbf16>, vector<104x16xf32> -> vector<104x16xf32>
    %c1_i32 = arith.constant 1 : i32
    %22 = tpu.dynamic_rotate %21 by %c1_i32 dim 0 : vector<104x16xf32>, i32 -> vector<104x16xf32>
    %23 = arith.addf %18, %22 : vector<104x16xf32>
    %c4 = arith.constant 4 : index
    %c0_15 = arith.constant 0 : index
    %c0_16 = arith.constant 0 : index
    %24 = vector.load %arg4[%c4, %c0_15, %c0_16] : memref<9x8x16xbf16, #tpu.memory_space<vmem>>, vector<1x8x16xbf16>
    %25 = vector.shape_cast %24 : vector<1x8x16xbf16> to vector<8x16xbf16>
    %cst_17 = arith.constant dense<0.000000e+00> : vector<104x16xf32>
    %26 = tpu.matmul %4, %25, %cst_17 {dimension_numbers = #tpu.dot_dimension_numbers<[1], [0], [0], [1], [0, 0, 1, 1], [], []>} : vector<104x8xbf16>, vector<8x16xbf16>, vector<104x16xf32> -> vector<104x16xf32>
    %27 = arith.addf %23, %26 : vector<104x16xf32>
    %c5 = arith.constant 5 : index
    %c0_18 = arith.constant 0 : index
    %c0_19 = arith.constant 0 : index
    %28 = vector.load %arg4[%c5, %c0_18, %c0_19] : memref<9x8x16xbf16, #tpu.memory_space<vmem>>, vector<1x8x16xbf16>
    %29 = vector.shape_cast %28 : vector<1x8x16xbf16> to vector<8x16xbf16>
    %cst_20 = arith.constant dense<0.000000e+00> : vector<104x16xf32>
    %30 = tpu.matmul %4, %29, %cst_20 {dimension_numbers = #tpu.dot_dimension_numbers<[1], [0], [0], [1], [0, 0, 1, 1], [], []>} : vector<104x8xbf16>, vector<8x16xbf16>, vector<104x16xf32> -> vector<104x16xf32>
    %c103_i32 = arith.constant 103 : i32
    %31 = tpu.dynamic_rotate %30 by %c103_i32 dim 0 : vector<104x16xf32>, i32 -> vector<104x16xf32>
    %32 = arith.addf %27, %31 : vector<104x16xf32>
    %c6 = arith.constant 6 : index
    %c0_21 = arith.constant 0 : index
    %c0_22 = arith.constant 0 : index
    %33 = vector.load %arg4[%c6, %c0_21, %c0_22] : memref<9x8x16xbf16, #tpu.memory_space<vmem>>, vector<1x8x16xbf16>
    %34 = vector.shape_cast %33 : vector<1x8x16xbf16> to vector<8x16xbf16>
    %cst_23 = arith.constant dense<0.000000e+00> : vector<104x16xf32>
    %35 = tpu.matmul %4, %34, %cst_23 {dimension_numbers = #tpu.dot_dimension_numbers<[1], [0], [0], [1], [0, 0, 1, 1], [], []>} : vector<104x8xbf16>, vector<8x16xbf16>, vector<104x16xf32> -> vector<104x16xf32>
    %c95_i32 = arith.constant 95 : i32
    %36 = tpu.dynamic_rotate %35 by %c95_i32 dim 0 : vector<104x16xf32>, i32 -> vector<104x16xf32>
    %37 = arith.addf %32, %36 : vector<104x16xf32>
    %c7 = arith.constant 7 : index
    %c0_24 = arith.constant 0 : index
    %c0_25 = arith.constant 0 : index
    %38 = vector.load %arg4[%c7, %c0_24, %c0_25] : memref<9x8x16xbf16, #tpu.memory_space<vmem>>, vector<1x8x16xbf16>
    %39 = vector.shape_cast %38 : vector<1x8x16xbf16> to vector<8x16xbf16>
    %cst_26 = arith.constant dense<0.000000e+00> : vector<104x16xf32>
    %40 = tpu.matmul %4, %39, %cst_26 {dimension_numbers = #tpu.dot_dimension_numbers<[1], [0], [0], [1], [0, 0, 1, 1], [], []>} : vector<104x8xbf16>, vector<8x16xbf16>, vector<104x16xf32> -> vector<104x16xf32>
    %c94_i32 = arith.constant 94 : i32
    %41 = tpu.dynamic_rotate %40 by %c94_i32 dim 0 : vector<104x16xf32>, i32 -> vector<104x16xf32>
    %42 = arith.addf %37, %41 : vector<104x16xf32>
    %c8 = arith.constant 8 : index
    %c0_27 = arith.constant 0 : index
    %c0_28 = arith.constant 0 : index
    %43 = vector.load %arg4[%c8, %c0_27, %c0_28] : memref<9x8x16xbf16, #tpu.memory_space<vmem>>, vector<1x8x16xbf16>
    %44 = vector.shape_cast %43 : vector<1x8x16xbf16> to vector<8x16xbf16>
    %cst_29 = arith.constant dense<0.000000e+00> : vector<104x16xf32>
    %45 = tpu.matmul %4, %44, %cst_29 {dimension_numbers = #tpu.dot_dimension_numbers<[1], [0], [0], [1], [0, 0, 1, 1], [], []>} : vector<104x8xbf16>, vector<8x16xbf16>, vector<104x16xf32> -> vector<104x16xf32>
    %c93_i32 = arith.constant 93 : i32
    %46 = tpu.dynamic_rotate %45 by %c93_i32 dim 0 : vector<104x16xf32>, i32 -> vector<104x16xf32>
    %47 = arith.addf %42, %46 : vector<104x16xf32>
    %c0_30 = arith.constant 0 : index
    %c0_31 = arith.constant 0 : index
    %48 = vector.load %arg8[%c0_30, %c0_31] : memref<104x16xf32, #tpu.memory_space<vmem>>, vector<104x16xf32>
    %49 = arith.addf %48, %47 : vector<104x16xf32>
    %c0_32 = arith.constant 0 : index
    %c0_33 = arith.constant 0 : index
    %50 = vector.load %arg8[%c0_32, %c0_33] : memref<104x16xf32, #tpu.memory_space<vmem>>, vector<104x16xf32>
    tpu.vector_store %arg8[%c0_32, %c0_33], %49 {strides = array<i32>} : memref<104x16xf32, #tpu.memory_space<vmem>>, vector<104x16xf32>,
    %c0_i32_34 = arith.constant 0 : i32
    %51 = arith.cmpi eq, %arg2, %c0_i32_34 : i32
    %52 = arith.extui %51 : i1 to i32
    %c0_i32_35 = arith.constant 0 : i32
    %53 = arith.cmpi ne, %52, %c0_i32_35 : i32
    scf.if %53 {
      %c0_36 = arith.constant 0 : index
      %c0_37 = arith.constant 0 : index
      %54 = vector.load %arg8[%c0_36, %c0_37] : memref<104x16xf32, #tpu.memory_space<vmem>>, vector<104x16xf32>
      %c0_38 = arith.constant 0 : index
      %c0_39 = arith.constant 0 : index
      %55 = vector.load %arg5[%c0_38, %c0_39] : memref<1x16xf32, #tpu.memory_space<vmem>>, vector<1x16xf32>
      %56 = vector.broadcast %55 : vector<1x16xf32> to vector<104x16xf32>
      %57 = arith.addf %54, %56 : vector<104x16xf32>
      %cst_40 = arith.constant 0.000000e+00 : f32
      %58 = vector.broadcast %cst_40 : f32 to vector<104x16xf32>
      %59 = arith.maximumf %57, %58 : vector<104x16xf32>
      %c0_41 = arith.constant 0 : index
      %c0_42 = arith.constant 0 : index
      %60 = vector.load %arg6[%c0_41, %c0_42] : memref<104x1xf32, #tpu.memory_space<vmem>>, vector<104x1xf32>
      %61 = vector.broadcast %60 : vector<104x1xf32> to vector<104x16xf32>
      %62 = arith.mulf %59, %61 : vector<104x16xf32>
      %63 = arith.truncf %62 : vector<104x16xf32> to vector<104x16xbf16>
      %c0_43 = arith.constant 0 : index
      %c0_44 = arith.constant 0 : index
      %c0_45 = arith.constant 0 : index
      %64 = vector.load %arg7[%c0_43, %c0_44, %c0_45] : memref<1x104x16xbf16, #tpu.memory_space<vmem>>, vector<1x104x16xbf16>
      %65 = vector.shape_cast %64 : vector<1x104x16xbf16> to vector<104x16xbf16>
      %66 = vector.shape_cast %63 : vector<104x16xbf16> to vector<1x104x16xbf16>
      tpu.vector_store %arg7[%c0_43, %c0_44, %c0_45], %66 {strides = array<i32>} : memref<1x104x16xbf16, #tpu.memory_space<vmem>>, vector<1x104x16xbf16>,
    } else {
    }
    return
  }
  func.func @transform_0(%arg0: i32, %arg1: i32, %arg2: i32) -> (i32, i32, i32) {
    %c0_i32 = arith.constant 0 : i32
    %c0_i32_0 = arith.constant 0 : i32
    return %arg0, %c0_i32, %arg2 : i32, i32, i32
  }
  func.func @transform_1(%arg0: i32, %arg1: i32, %arg2: i32) -> (i32, i32, i32) {
    %c0_i32 = arith.constant 0 : i32
    %c0_i32_0 = arith.constant 0 : i32
    return %c0_i32, %arg2, %arg1 : i32, i32, i32
  }
  func.func @transform_2(%arg0: i32, %arg1: i32, %arg2: i32) -> (i32, i32) {
    %c0_i32 = arith.constant 0 : i32
    %c0_i32_0 = arith.constant 0 : i32
    return %c0_i32, %arg1 : i32, i32
  }
  func.func @transform_3(%arg0: i32, %arg1: i32, %arg2: i32) -> (i32, i32) {
    %c0_i32 = arith.constant 0 : i32
    %c0_i32_0 = arith.constant 0 : i32
    %c0_i32_1 = arith.constant 0 : i32
    return %c0_i32, %c0_i32_0 : i32, i32
  }
  func.func @transform_4(%arg0: i32, %arg1: i32, %arg2: i32) -> (i32, i32, i32) {
    %c0_i32 = arith.constant 0 : i32
    %c0_i32_0 = arith.constant 0 : i32
    return %arg0, %c0_i32, %arg1 : i32, i32, i32
  }
}

</mosaic_0001>

<bundles_post_ra>
// kernel: tpu_custom_call.1
= control target key start
LH: loop header
LB: loop body
LE: loop exit
PB: predicated region body
PF: predicated region fallthrough
CT: control target
= control target key end

     0   :  { %6 = vsyncpa [#allocation3], 0  ;;  %s125_s0 = inlined_call_operand.hbm [shape: f32[8,128], index: 0, kind: input, shape index: {}]   ;;  %s126_s1 = inlined_call_operand.hbm [shape: f32[8,128], index: 1, kind: output, shape index: {}]  }
   0x1   :  { %7 = vsyncpa [#allocation4], 0  ;;  %s89_s6 = smov [#allocation2]   ;;  %s41_s10 = scalar_lea.hbm %s125_s0, 128 }
   0x2   :  { %s14_s7 = sshll.u32 %s89_s6, 4  ;;  %p42_p0 = scmp.ne.s32.totalorder %s125_s0, %s41_s10  ;;  %s15_s7 = int_to_ptr.vmem [resolvable:$true] %s14_s7 }
   0x3   :  { %p45_p1 = scmp.lt.u32.totalorder %s41_s10, %s125_s0 }
   0x5   :  { %p47_p2 = pnand %p45_p1, %p42_p0 }
   0x7   :  { %50 = shalt.err (!%p47_p2)
}
   0x8   :  { %s51_s15 = scalar_lea.vmem %s15_s7, 128  ;;  %p56_p4 = scmp.lt.s32.totalorder %s15_s7, %s15_s7 }
   0x9   :  { %p52_p3 = scmp.ne.s32.totalorder %s15_s7, %s51_s15  ;;  %p57_p5 = scmp.lt.s32.totalorder %s51_s15, %s51_s15 }
   0xb   :  { %p58_p6 = por %p57_p5, %p56_p4 }
   0xd   :  { %p59_p7 = pnand %p58_p6, %p52_p3 }
   0xf   :  { %62 = shalt.err (!%p59_p7)
}
  0x10   :  { %17 = dma.hbm_to_vmem [thread:$0]  %s125_s0, 128, %s15_s7, [#allocation3]  }
  0x11   :  { %85 = dma.done.wait [#allocation3], 128  }
  0x12   :  { %86 = vsyncadd [#allocation3], 4294967168  ;;  %s90_s18 = smov [#allocation5]   ;;  %v21_v0 = vld [vmem:[#allocation2] sm:$0xff] }
  0x13   :  { %s30_s19 = sshll.u32 %s90_s18, 4  ;;  %v22_v1 = vrot.slane %v21_v0, 7  ;;  %s31_s19 = int_to_ptr.vmem [resolvable:$true] %s30_s19 }
  0x14   :  { %s63_s20 = scalar_lea.vmem %s31_s19, 128  ;;  %p68_p9 = scmp.lt.s32.totalorder %s31_s19, %s31_s19 }
  0x15   :  { %23 = vst [vmem:[#allocation5] sm:$0xff] %v22_v1  ;;  %p64_p8 = scmp.ne.s32.totalorder %s31_s19, %s63_s20  ;;  %p69_p10 = scmp.lt.s32.totalorder %s63_s20, %s63_s20 }
  0x17   :  { %p70_p11 = por %p69_p10, %p68_p9 }
  0x19   :  { %p71_p12 = pnand %p70_p11, %p64_p8 }
  0x1b   :  { %74 = shalt.err (!%p71_p12)
}
  0x1c   :  { %s75_s23 = scalar_lea.hbm %s126_s1, 128 }
  0x1d   :  { %p76_p13 = scmp.ne.s32.totalorder %s126_s1, %s75_s23  ;;  %p79_p0 = scmp.lt.u32.totalorder %s75_s23, %s126_s1 }
  0x1f   :  { %p81_p1 = pnand %p79_p0, %p76_p13 }
  0x21   :  { %84 = shalt.err (!%p81_p1)
}
  0x22   :  { %33 = dma.vmem_to_hbm [thread:$0]  %s31_s19, 128, %s126_s1, [#allocation4]  }
  0x23   :  { %87 = dma.done.wait [#allocation4], 128  }
  0x24   :  { %88 = vsyncadd [#allocation4], 4294967168 }
  0x25   :  { %37 = vsyncpa [#allocation3], 1 }
  0x26   :  { %38 = vsyncpa [#allocation4], 1 }

// kernel: tpu_custom_call.1
= control target key start
LH: loop header
LB: loop body
LE: loop exit
PB: predicated region body
PF: predicated region fallthrough
CT: control target
= control target key end

     0   :  { %s2435_s15 = smov 0   ;;  %s2437_s16 = smov 0   ;;  %s3354_s0 = inlined_call_operand.vmem [shape: bf16[2,104,8], index: 0, kind: input, shape index: {}]   ;;  %s3355_s1 = inlined_call_operand.vmem [shape: bf16[9,8,16], index: 1, kind: input, shape index: {}]   ;;  %s3356_s2 = inlined_call_operand.vmem [shape: f32[1,16], index: 2, kind: input, shape index: {}]   ;;  %s3357_s3 = inlined_call_operand.vmem [shape: f32[104,1], index: 3, kind: input, shape index: {}]   ;;  %s3358_s4 = inlined_call_operand.vmem [shape: bf16[2,104,16], index: 4, kind: output, shape index: {}]  }
   0x1   :  { %s2439_s17 = smov 0  }
   0x2 LB: > { %s33_s18 = sadd.s32 1, %s2401_s16  ;;  %p1892_p0 = scmp.ge.s32.totalorder %s2405_s17, 1  ;;  %s2405_s17 = sphi %s2439_s17, %s14_s17   ;;  %s2401_s16 = sphi %s2437_s16, %s3360_s16   ;;  %s2397_s15 = sphi %s2435_s15, %s3359_s15  }
   0x3   : > { %p35_p1 = scmp.ge.s32.totalorder %s33_s18, 2  ;;  %p210_p2 = scmp.lt.s32.totalorder %s2405_s17, 3 }
   0x5   : > { %s3362_s18 = smov (%p35_p1, %s33_s18), 0  ;;  %p211_p3 = pnand %p1892_p0, %p210_p2 }
   0x6   : > { %v310_v0 = vld [vmem:[%s3355_s1] sm:$0xf] (!%p211_p3)  ;;  %vm366_vm0 = vcmask (!%p211_p3), 1043456   ;;  %p252_p4 = scmp.lt.s32.totalorder (!%p211_p3), %s2397_s15, 1  ;;  %v2407_v1 = vmov (!%p211_p3), 0.0   ;;  %vm2408_vm1 = vmmov (!%p211_p3), 0   ;;  %v471_v40 = vlaneseq (!%p211_p3) }
   0x7   : > { %214 = sbr.rel (%p211_p3) target bundleno = 503 (0x1f7), region = 36  ;;  %2074 = vmatprep.subr.bf16.mxu0 (!%p211_p3), %v2407_v1  ;;  %2344 = vmatprep.subr.bf16.mxu1 (!%p211_p3), %v2407_v1  ;;  %v368_v2 = vsel (!%p211_p3), %vm366_vm0, %v310_v0, 0  ;;  %v1917_v3 = vld [vmem:[%s3355_s1 + $0x8] sm:$0xf] (!%p211_p3)  ;;  %v1909_v4 = vld [vmem:[%s3355_s1 + $0x4] sm:$0xf] (!%p211_p3) }
   0x8   : > { %2075 = vmatpush3.bf16.msra.mxu0 (!%p211_p3), %v368_v2  ;;  %2345 = vmatpush3.bf16.msra.mxu1 (!%p211_p3), %v368_v2  ;;  %vm344_vm2 = vcmask (!%p211_p3), 64512   ;;  %v623_v6 = vsel (!%p211_p3), %vm366_vm0, %v1917_v3, 0  ;;  %v490_v8 = vsel (!%p211_p3), %vm366_vm0, %v1909_v4, 0  ;;  %v1925_v14 = vld [vmem:[%s3355_s1 + $0xc] sm:$0xf] (!%p211_p3)  ;;  %v1611_v26 = vld [vmem:[%s3357_s3] sm:$0xff] (!%p211_p3) }
   0x9   : > { %2076 = vmatprep.mubr.msk.bf16.mxu0 (!%p211_p3), %vm2408_vm1, %v2407_v1  ;;  %2092 = vmatprep.mubr.msk.bf16.mxu1 (!%p211_p3), %vm2408_vm1, %v2407_v1  ;;  %v756_v15 = vsel (!%p211_p3), %vm366_vm0, %v1925_v14, 0  ;;  %v1933_v16 = vld [vmem:[%s3355_s1 + $0x10] sm:$0xf] (!%p211_p3)  ;;  %v1941_v18 = vld [vmem:[%s3355_s1 + $0x14] sm:$0xf] (!%p211_p3)  ;;  %v2409_v27 = vmov (!%p211_p3), 0  }
   0xa   : > { %2134 = vmatprep.subr.bf16.mxu0 (!%p211_p3), %v2407_v1  ;;  %2104 = vmatprep.subr.bf16.mxu1 (!%p211_p3), %v2407_v1  ;;  %v888_v17 = vsel (!%p211_p3), %vm366_vm0, %v1933_v16, 0  ;;  %v994_v19 = vsel (!%p211_p3), %vm366_vm0, %v1941_v18, 0  ;;  %v1949_v20 = vld [vmem:[%s3355_s1 + $0x18] sm:$0xf] (!%p211_p3)  ;;  %v1957_v22 = vld [vmem:[%s3355_s1 + $0x1c] sm:$0xf] (!%p211_p3) }
   0xb   : > { %v1127_v21 = vsel (!%p211_p3), %vm366_vm0, %v1949_v20, 0  ;;  %v1259_v23 = vsel (!%p211_p3), %vm366_vm0, %v1957_v22, 0  ;;  %v1965_v24 = vld [vmem:[%s3355_s1 + $0x20] sm:$0xf] (!%p211_p3)  ;;  %2374 = vset.pattern.permute.xlu0 (!%p211_p3), %v2409_v27  ;;  %2375 = vset.pattern.permute.xlu1 (!%p211_p3), %v2409_v27  ;;  %v1612_v28 = vld [vmem:[%s3357_s3 + $0x8] sm:$0xff] (!%p211_p3)  ;;  %v1617_v30 = vld [vmem:[%s3357_s3 + $0x30] sm:$0xff] (!%p211_p3) }
   0xc   : > { %v1392_v25 = vsel (!%p211_p3), %vm366_vm0, %v1965_v24, 0  ;;  %1626 = vperm.xlu0 (!%p211_p3), %2374, %v1611_v26   ;;  %v1615_v29 = vld [vmem:[%s3357_s3 + $0x20] sm:$0xff] (!%p211_p3)  ;;  %v1621_v32 = vld [vmem:[%s3357_s3 + $0x50] sm:$0xff] (!%p211_p3)  ;;  %v1614_v35 = vld [vmem:[%s3357_s3 + $0x18] sm:$0xff] (!%p211_p3)  ;;  %v2776_v41 = vshrl.u32 (!%p211_p3), %v471_v40, 7  ;;  %vm283_vm6 = vcmask (!%p211_p3), 130048  }
   0xd   : > { %v1619_v31 = vld [vmem:[%s3357_s3 + $0x40] sm:$0xff] (!%p211_p3)  ;;  %v1613_v34 = vld [vmem:[%s3357_s3 + $0x10] sm:$0xff] (!%p211_p3)  ;;  %v1616_v36 = vld [vmem:[%s3357_s3 + $0x28] sm:$0xff] (!%p211_p3)  ;;  %296 = vst.msk [vmem:[#allocation2 + $0x60] sm:$0xff] (!%p211_p3), %vm283_vm6, %v2407_v1  ;;  %vm1755_vm10 = vcmask (!%p211_p3), 125952  }
   0xe   : > { %s3364_s15 = smov (!%p252_p4, %s2397_s15), 1  ;;  %v1623_v33 = vld [vmem:[%s3357_s3 + $0x60] sm:$0xff]  ;;  %1636 = vperm.xlu1 %2375, %v1613_v34   ;;  %v1618_v37 = vld [vmem:[%s3357_s3 + $0x38] sm:$0xff]  ;;  %v1620_v38 = vld [vmem:[%s3357_s3 + $0x48] sm:$0xff]  ;;  %vm473_vm3 = vcmp.lt.s32.totalorder %v2776_v41, 3  ;;  %vm593_vm4 = vcmp.lt.s32.totalorder %v2776_v41, 2 }
   0xf   : > { %s2346_s21 = smul.u32 52, %s3364_s15  ;;  %v1622_v39 = vld [vmem:[%s3357_s3 + $0x58] sm:$0xff]  ;;  %vm726_vm5 = vcmp.lt.s32.totalorder %v2776_v41, 1  ;;  %284 = vst.msk [vmem:[#allocation2] sm:$0xff] %vm283_vm6, %v2407_v1  ;;  %285 = vst.msk [vmem:[#allocation2 + $0x8] sm:$0xff] %vm283_vm6, %v2407_v1  ;;  %vm1097_vm7 = vcmp.lt.s32.totalorder %v2776_v41, 7 }
  0x10   : > { %1631 = vperm.xlu0 %2374, %v1612_v28   ;;  %286 = vst.msk [vmem:[#allocation2 + $0x10] sm:$0xff] %vm283_vm6, %v2407_v1  ;;  %287 = vst.msk [vmem:[#allocation2 + $0x18] sm:$0xff] %vm283_vm6, %v2407_v1  ;;  %vm1362_vm8 = vcmp.lt.s32.totalorder %v2776_v41, 6  ;;  %vm1495_vm9 = vcmp.lt.s32.totalorder %v2776_v41, 5 }
  0x11   : > { %s259_s28 = scalar_lea.vmem %s3354_s0, %s2346_s21  ;;  %288 = vst.msk [vmem:[#allocation2 + $0x20] sm:$0xff] %vm283_vm6, %v2407_v1  ;;  %289 = vst.msk [vmem:[#allocation2 + $0x28] sm:$0xff] %vm283_vm6, %v2407_v1  ;;  %s3251_s29 = scalar_lea.vmem %s3358_s4, %s2346_s21 }
  0x12   : > { %v2479_v5 = vld [vmem:[%s259_s28] sm:$0xff]   ;;  %v2494_v9 = vld [vmem:[%s259_s28 + $0x8] sm:$0xff]   ;;  %v2507_v11 = vld [vmem:[%s259_s28 + $0x10] sm:$0xff]   ;;  %1641 = vperm.xlu1 %2375, %v1614_v35   ;;  %290 = vst.msk [vmem:[#allocation2 + $0x30] sm:$0xff] %vm283_vm6, %v2407_v1 }
  0x13   : > { %v2482_v7 = vld [vmem:[%s259_s28 + $0x20] sm:$0xff]   ;;  %2077 = vmatmul.mubr.msk.bf16.vlgmr.msra.gmra.mrb[0].mxu0 %vm344_vm2, %v2479_v5  ;;  %v2497_v10 = vld [vmem:[%s259_s28 + $0x28] sm:$0xff]   ;;  %v2509_v12 = vld [vmem:[%s259_s28 + $0x30] ss:$0 sps:$4 sm:$0xff]   ;;  %291 = vst.msk [vmem:[#allocation2 + $0x38] sm:$0xff] %vm283_vm6, %v2407_v1 }
  0x14   : > { %2093 = vmatmul.mubr.msk.bf16.vlgmr.msra.gmra.mrb[0].mxu1 %vm344_vm2, %v2482_v7  ;;  %2135 = vmatpush3.bf16.msra.mxu0 %v623_v6  ;;  %v2519_v13 = vld [vmem:[%s259_s28 + $0x18] sm:$0xff]   ;;  %292 = vst.msk [vmem:[#allocation2 + $0x40] sm:$0xff] %vm283_vm6, %v2407_v1  ;;  %293 = vst.msk [vmem:[#allocation2 + $0x48] sm:$0xff] %vm283_vm6, %v2407_v1 }
  0x15   : > { %2105 = vmatpush3.bf16.msra.mxu1 %v490_v8  ;;  %2080 = vmatprep.mubr.msk.bf16.mxu0 %vm2408_vm1, %v2407_v1  ;;  %294 = vst.msk [vmem:[#allocation2 + $0x50] sm:$0xff] %vm283_vm6, %v2407_v1  ;;  %295 = vst.msk [vmem:[#allocation2 + $0x58] sm:$0xff] %vm283_vm6, %v2407_v1 }
  0x16   : > { %2096 = vmatprep.mubr.msk.bf16.mxu1 %vm2408_vm1, %v2407_v1  ;;  %2164 = vmatprep.subr.bf16.mxu1 %v2407_v1 }
  0x17   : > { %2194 = vmatprep.subr.bf16.mxu0 %v2407_v1  ;;  %1646 = vperm.xlu0 %2374, %v1615_v29  }
  0x18   : > { %1651 = vperm.xlu1 %2375, %v1616_v36  }
  0x1b   : > { %2081 = vmatmul.mubr.msk.bf16.gmra.mrb[4].mxu0 %vm344_vm2, %v2494_v9  ;;  %1656 = vperm.xlu0 %2374, %v1617_v30  }
  0x1c   : > { %2097 = vmatmul.mubr.msk.bf16.gmra.mrb[4].mxu1 %vm344_vm2, %v2497_v10  ;;  %2084 = vmatprep.mubr.msk.bf16.mxu0 %vm2408_vm1, %v2407_v1 }
  0x1d   : > { %2100 = vmatprep.mubr.msk.bf16.mxu1 %vm2408_vm1, %v2407_v1  ;;  %1661 = vperm.xlu1 %2375, %v1618_v37  }
  0x1f   : > { %1666 = vperm.xlu0 %2374, %v1619_v31  }
  0x21   : > { %1671 = vperm.xlu1 %2375, %v1620_v38  }
  0x23   : > { %2085 = vmatmul.mubr.msk.bf16.gmra.mrb[8].mxu0 %vm344_vm2, %v2507_v11  ;;  %1676 = vperm.xlu0 %2374, %v1621_v32  }
  0x24   : > { %2101 = vmatmul.mubr.msk.bf16.gmra.mrb[8].mxu1 %vm344_vm2, %v2509_v12  ;;  %2088 = vmatprep.mubr.msk.bf16.mxu0 %vm2408_vm1, %v2407_v1 }
  0x25   : > { %2106 = vmatprep.mubr.msk.bf16.mxu1 %vm2408_vm1, %v2407_v1  ;;  %1681 = vperm.xlu1 %2375, %v1622_v39  }
  0x27   : > { %1686 = vperm.xlu0 %2374, %v1623_v33  }
  0x2b   : > { %2089 = vmatmul.mubr.msk.bf16.gmra.mrb[12].mxu0 %vm344_vm2, %v2519_v13 }
  0x2c   : > { %2107 = vmatmul.mubr.msk.bf16.vlgmr.msra.gmra.mrb[12].mxu1 %vm344_vm2, %v2479_v5  ;;  %2136 = vmatprep.mubr.msk.bf16.mxu0 %vm2408_vm1, %v2407_v1 }
  0x2d   : > { %2165 = vmatpush3.bf16.msra.mxu1 %v756_v15  ;;  %2110 = vmatprep.mubr.msk.bf16.mxu1 %vm2408_vm1, %v2407_v1 }
  0x2e   : > { %2224 = vmatprep.subr.bf16.mxu1 %v2407_v1 }
  0x33   : > { %2137 = vmatmul.mubr.msk.bf16.vlgmr.msra.gmra.mrb[16].mxu0 %vm344_vm2, %v2479_v5 }
  0x34   : > { %2111 = vmatmul.mubr.msk.bf16.gmra.mrb[16].mxu1 %vm344_vm2, %v2494_v9  ;;  %2195 = vmatpush3.bf16.msra.mxu0 %v888_v17 }
  0x35   : > { %2114 = vmatprep.mubr.msk.bf16.mxu1 %vm2408_vm1, %v2407_v1  ;;  %2140 = vmatprep.mubr.msk.bf16.mxu0 %vm2408_vm1, %v2407_v1 }
  0x36   : > { %2254 = vmatprep.subr.bf16.mxu0 %v2407_v1 }
  0x3b   : > { %2141 = vmatmul.mubr.msk.bf16.gmra.mrb[20].mxu0 %vm344_vm2, %v2494_v9 }
  0x3c   : > { %2115 = vmatmul.mubr.msk.bf16.gmra.mrb[20].mxu1 %vm344_vm2, %v2507_v11  ;;  %2144 = vmatprep.mubr.msk.bf16.mxu0 %vm2408_vm1, %v2407_v1 }
  0x3d   : > { %2118 = vmatprep.mubr.msk.bf16.mxu1 %vm2408_vm1, %v2407_v1 }
  0x43   : > { %2145 = vmatmul.mubr.msk.bf16.gmra.mrb[24].mxu0 %vm344_vm2, %v2507_v11 }
  0x44   : > { %2119 = vmatmul.mubr.msk.bf16.gmra.mrb[24].mxu1 %vm344_vm2, %v2519_v13  ;;  %2148 = vmatprep.mubr.msk.bf16.mxu0 %vm2408_vm1, %v2407_v1 }
  0x45   : > { %2122 = vmatprep.mubr.msk.bf16.mxu1 %vm2408_vm1, %v2407_v1 }
  0x4b   : > { %2149 = vmatmul.mubr.msk.bf16.gmra.mrb[28].mxu0 %vm344_vm2, %v2519_v13 }
  0x4c   : > { %2123 = vmatmul.mubr.msk.bf16.gmra.mrb[28].mxu1 %vm344_vm2, %v2482_v7  ;;  %2152 = vmatprep.mubr.msk.bf16.mxu0 %vm2408_vm1, %v2407_v1 }
  0x4d   : > { %2126 = vmatprep.mubr.msk.bf16.mxu1 %vm2408_vm1, %v2407_v1 }
  0x53   : > { %2153 = vmatmul.mubr.msk.bf16.gmra.mrb[32].mxu0 %vm344_vm2, %v2482_v7 }
  0x54   : > { %2127 = vmatmul.mubr.msk.bf16.gmra.mrb[32].mxu1 %vm344_vm2, %v2497_v10  ;;  %2156 = vmatprep.mubr.msk.bf16.mxu0 %vm2408_vm1, %v2407_v1 }
  0x55   : > { %2130 = vmatprep.mubr.msk.bf16.mxu1 %vm2408_vm1, %v2407_v1 }
  0x5b   : > { %2157 = vmatmul.mubr.msk.bf16.gmra.mrb[36].mxu0 %vm344_vm2, %v2497_v10 }
  0x5c   : > { %2131 = vmatmul.mubr.msk.bf16.gmra.mrb[36].mxu1 %vm344_vm2, %v2509_v12  ;;  %2160 = vmatprep.mubr.msk.bf16.mxu0 %vm2408_vm1, %v2407_v1 }
  0x5d   : > { %2166 = vmatprep.mubr.msk.bf16.mxu1 %vm2408_vm1, %v2407_v1 }
  0x63   : > { %2161 = vmatmul.mubr.msk.bf16.gmra.mrb[40].mxu0 %vm344_vm2, %v2509_v12 }
  0x64   : > { %2167 = vmatmul.mubr.msk.bf16.vlgmr.msra.gmra.mrb[40].mxu1 %vm344_vm2, %v2479_v5  ;;  %2196 = vmatprep.mubr.msk.bf16.mxu0 %vm2408_vm1, %v2407_v1 }
  0x65   : > { %2225 = vmatpush3.bf16.msra.mxu1 %v994_v19  ;;  %2170 = vmatprep.mubr.msk.bf16.mxu1 %vm2408_vm1, %v2407_v1 }
  0x66   : > { %2284 = vmatprep.subr.bf16.mxu1 %v2407_v1 }
  0x6b   : > { %2197 = vmatmul.mubr.msk.bf16.vlgmr.msra.gmra.mrb[44].mxu0 %vm344_vm2, %v2479_v5 }
  0x6c   : > { %2171 = vmatmul.mubr.msk.bf16.gmra.mrb[44].mxu1 %vm344_vm2, %v2494_v9  ;;  %2255 = vmatpush3.bf16.msra.mxu0 %v1127_v21 }
  0x6d   : > { %2174 = vmatprep.mubr.msk.bf16.mxu1 %vm2408_vm1, %v2407_v1  ;;  %2200 = vmatprep.mubr.msk.bf16.mxu0 %vm2408_vm1, %v2407_v1 }
  0x6e   : > { %2314 = vmatprep.subr.bf16.mxu0 %v2407_v1 }
  0x73   : > { %2201 = vmatmul.mubr.msk.bf16.gmra.mrb[48].mxu0 %vm344_vm2, %v2494_v9 }
  0x74   : > { %2175 = vmatmul.mubr.msk.bf16.gmra.mrb[48].mxu1 %vm344_vm2, %v2507_v11  ;;  %2204 = vmatprep.mubr.msk.bf16.mxu0 %vm2408_vm1, %v2407_v1 }
  0x75   : > { %2178 = vmatprep.mubr.msk.bf16.mxu1 %vm2408_vm1, %v2407_v1 }
  0x7b   : > { %2205 = vmatmul.mubr.msk.bf16.gmra.mrb[52].mxu0 %vm344_vm2, %v2507_v11 }
  0x7c   : > { %2179 = vmatmul.mubr.msk.bf16.gmra.mrb[52].mxu1 %vm344_vm2, %v2519_v13  ;;  %2208 = vmatprep.mubr.msk.bf16.mxu0 %vm2408_vm1, %v2407_v1 }
  0x7d   : > { %2182 = vmatprep.mubr.msk.bf16.mxu1 %vm2408_vm1, %v2407_v1 }
  0x83   : > { %2209 = vmatmul.mubr.msk.bf16.gmra.mrb[56].mxu0 %vm344_vm2, %v2519_v13 }
  0x84   : > { %2183 = vmatmul.mubr.msk.bf16.gmra.mrb[56].mxu1 %vm344_vm2, %v2482_v7  ;;  %2212 = vmatprep.mubr.msk.bf16.mxu0 %vm2408_vm1, %v2407_v1 }
  0x85   : > { %2186 = vmatprep.mubr.msk.bf16.mxu1 %vm2408_vm1, %v2407_v1 }
  0x8b   : > { %2213 = vmatmul.mubr.msk.bf16.gmra.mrb[60].mxu0 %vm344_vm2, %v2482_v7 }
  0x8c   : > { %2187 = vmatmul.mubr.msk.bf16.gmra.mrb[60].mxu1 %vm344_vm2, %v2497_v10  ;;  %2216 = vmatprep.mubr.msk.bf16.mxu0 %vm2408_vm1, %v2407_v1 }
  0x8d   : > { %2190 = vmatprep.mubr.msk.bf16.mxu1 %vm2408_vm1, %v2407_v1 }
  0x93   : > { %2217 = vmatmul.mubr.msk.bf16.gmra.mrb[64].mxu0 %vm344_vm2, %v2497_v10 }
  0x94   : > { %2191 = vmatmul.mubr.msk.bf16.gmra.mrb[64].mxu1 %vm344_vm2, %v2509_v12  ;;  %2220 = vmatprep.mubr.msk.bf16.mxu0 %vm2408_vm1, %v2407_v1 }
  0x95   : > { %2226 = vmatprep.mubr.msk.bf16.mxu1 %vm2408_vm1, %v2407_v1 }
  0x9b   : > { %2221 = vmatmul.mubr.msk.bf16.gmra.mrb[68].mxu0 %vm344_vm2, %v2509_v12 }
  0x9c   : > { %2227 = vmatmul.mubr.msk.bf16.vlgmr.msra.gmra.mrb[68].mxu1 %vm344_vm2, %v2479_v5  ;;  %2256 = vmatprep.mubr.msk.bf16.mxu0 %vm2408_vm1, %v2407_v1 }
  0x9d   : > { %2285 = vmatpush3.bf16.msra.mxu1 %v1259_v23  ;;  %2230 = vmatprep.mubr.msk.bf16.mxu1 %vm2408_vm1, %v2407_v1 }
  0xa3   : > { %2257 = vmatmul.mubr.msk.bf16.vlgmr.msra.gmra.mrb[72].mxu0 %vm344_vm2, %v2479_v5 }
  0xa4   : > { %2231 = vmatmul.mubr.msk.bf16.gmra.mrb[72].mxu1 %vm344_vm2, %v2494_v9  ;;  %2315 = vmatpush3.bf16.msra.mxu0 %v1392_v25 }
  0xa5   : > { %2234 = vmatprep.mubr.msk.bf16.mxu1 %vm2408_vm1, %v2407_v1  ;;  %2260 = vmatprep.mubr.msk.bf16.mxu0 %vm2408_vm1, %v2407_v1 }
  0xab   : > { %2261 = vmatmul.mubr.msk.bf16.gmra.mrb[76].mxu0 %vm344_vm2, %v2494_v9 }
  0xac   : > { %2235 = vmatmul.mubr.msk.bf16.gmra.mrb[76].mxu1 %vm344_vm2, %v2507_v11  ;;  %2264 = vmatprep.mubr.msk.bf16.mxu0 %vm2408_vm1, %v2407_v1 }
  0xad   : > { %2238 = vmatprep.mubr.msk.bf16.mxu1 %vm2408_vm1, %v2407_v1 }
  0xb3   : > { %2265 = vmatmul.mubr.msk.bf16.gmra.mrb[80].mxu0 %vm344_vm2, %v2507_v11 }
  0xb4   : > { %2239 = vmatmul.mubr.msk.bf16.gmra.mrb[80].mxu1 %vm344_vm2, %v2519_v13  ;;  %2268 = vmatprep.mubr.msk.bf16.mxu0 %vm2408_vm1, %v2407_v1 }
  0xb5   : > { %2242 = vmatprep.mubr.msk.bf16.mxu1 %vm2408_vm1, %v2407_v1 }
  0xbb   : > { %2269 = vmatmul.mubr.msk.bf16.gmra.mrb[84].mxu0 %vm344_vm2, %v2519_v13 }
  0xbc   : > { %2243 = vmatmul.mubr.msk.bf16.gmra.mrb[84].mxu1 %vm344_vm2, %v2482_v7  ;;  %2272 = vmatprep.mubr.msk.bf16.mxu0 %vm2408_vm1, %v2407_v1 }
  0xbd   : > { %2246 = vmatprep.mubr.msk.bf16.mxu1 %vm2408_vm1, %v2407_v1 }
  0xc3   : > { %2273 = vmatmul.mubr.msk.bf16.gmra.mrb[88].mxu0 %vm344_vm2, %v2482_v7 }
  0xc4   : > { %2247 = vmatmul.mubr.msk.bf16.gmra.mrb[88].mxu1 %vm344_vm2, %v2497_v10  ;;  %2276 = vmatprep.mubr.msk.bf16.mxu0 %vm2408_vm1, %v2407_v1 }
  0xc5   : > { %2250 = vmatprep.mubr.msk.bf16.mxu1 %vm2408_vm1, %v2407_v1 }
  0xcb   : > { %2277 = vmatmul.mubr.msk.bf16.gmra.mrb[92].mxu0 %vm344_vm2, %v2497_v10 }
  0xcc   : > { %2251 = vmatmul.mubr.msk.bf16.gmra.mrb[92].mxu1 %vm344_vm2, %v2509_v12  ;;  %2280 = vmatprep.mubr.msk.bf16.mxu0 %vm2408_vm1, %v2407_v1 }
  0xcd   : > { %2286 = vmatprep.mubr.msk.bf16.mxu1 %vm2408_vm1, %v2407_v1 }
  0xd3   : > { %2281 = vmatmul.mubr.msk.bf16.gmra.mrb[96].mxu0 %vm344_vm2, %v2509_v12 }
  0xd4   : > { %2287 = vmatmul.mubr.msk.bf16.vlgmr.msra.gmra.mrb[96].mxu1 %vm344_vm2, %v2479_v5  ;;  %2316 = vmatprep.mubr.msk.bf16.mxu0 %vm2408_vm1, %v2407_v1 }
  0xd5   : > { %2290 = vmatprep.mubr.msk.bf16.mxu1 %vm2408_vm1, %v2407_v1 }
  0xdb   : > { %2317 = vmatmul.mubr.msk.bf16.vlgmr.msra.gmra.mrb[100].mxu0 %vm344_vm2, %v2479_v5 }
  0xdc   : > { %2291 = vmatmul.mubr.msk.bf16.gmra.mrb[100].mxu1 %vm344_vm2, %v2494_v9  ;;  %2320 = vmatprep.mubr.msk.bf16.mxu0 %vm2408_vm1, %v2407_v1 }
  0xdd   : > { %2294 = vmatprep.mubr.msk.bf16.mxu1 %vm2408_vm1, %v2407_v1 }
  0xe3   : > { %2321 = vmatmul.mubr.msk.bf16.gmra.mrb[104].mxu0 %vm344_vm2, %v2494_v9 }
  0xe4   : > { %2295 = vmatmul.mubr.msk.bf16.gmra.mrb[104].mxu1 %vm344_vm2, %v2507_v11  ;;  %2324 = vmatprep.mubr.msk.bf16.mxu0 %vm2408_vm1, %v2407_v1 }
  0xe5   : > { %2298 = vmatprep.mubr.msk.bf16.mxu1 %vm2408_vm1, %v2407_v1 }
  0xe6   : > { %v404_v42 = vpop.f32.mrb[0].mxu0 }
  0xe7   : > { %v2078_v43 = vpop.f32.mrb[1].mxu0  ;;  %v2782_v44 = vpop.f32.mrb[0].mxu1  ;;  %v458_v48 = vrot.slane %v404_v42, 5 }
  0xe8   : > { %v407_v45 = vpop.f32.mrb[2].mxu0  ;;  %v466_v46 = vrot.slane %v2782_v44, 5  ;;  %v2094_v47 = vpop.f32.mrb[1].mxu1 }
  0xe9   : > { %v459_v49 = vrot.slane %v407_v45, 5  ;;  %v2079_v50 = vpop.f32.mrb[3].mxu0  ;;  %v439_v51 = vpop.f32.mrb[2].mxu1 }
  0xea   : > { %v467_v52 = vrot.slane %v439_v51, 5  ;;  %v2095_v53 = vpop.f32.mrb[3].mxu1 }
  0xeb   : > { %v2788_v54 = vsel %vm473_vm3, %v458_v48, %v459_v49  ;;  %2325 = vmatmul.mubr.msk.bf16.gmra.mrb[108].mxu0 %vm344_vm2, %v2507_v11 }
  0xec   : > { %v2796_v55 = vsel %vm473_vm3, %v466_v46, %v467_v52  ;;  %2299 = vmatmul.mubr.msk.bf16.gmra.mrb[108].mxu1 %vm344_vm2, %v2519_v13  ;;  %2328 = vmatprep.mubr.msk.bf16.mxu0 %vm2408_vm1, %v2407_v1 }
  0xed   : > { %2302 = vmatprep.mubr.msk.bf16.mxu1 %vm2408_vm1, %v2407_v1 }
  0xee   : > { %v412_v56 = vpop.f32.mrb[4].mxu0 }
  0xef   : > { %v460_v57 = vrot.slane %v412_v56, 5  ;;  %v444_v58 = vpop.f32.mrb[4].mxu1  ;;  %v2082_v59 = vpop.f32.mrb[5].mxu0 }
  0xf0   : > { %v468_v60 = vrot.slane %v444_v58, 5  ;;  %v415_v61 = vpop.f32.mrb[6].mxu0  ;;  %v2098_v62 = vpop.f32.mrb[5].mxu1 }
  0xf1   : > { %v2806_v63 = vsel %vm473_vm3, %v459_v49, %v460_v57  ;;  %v461_v0 = vrot.slane %v415_v61, 5  ;;  %v2083_v2 = vpop.f32.mrb[7].mxu0  ;;  %v447_v3 = vpop.f32.mrb[6].mxu1 }
  0xf2   : > { %v2810_v4 = vsel %vm473_vm3, %v467_v52, %v468_v60  ;;  %v469_v5 = vrot.slane %v447_v3, 5  ;;  %v2099_v6 = vpop.f32.mrb[7].mxu1 }
  0xf3   : > { %v2814_v8 = vsel %vm473_vm3, %v460_v57, %v461_v0  ;;  %2329 = vmatmul.mubr.msk.bf16.gmra.mrb[112].mxu0 %vm344_vm2, %v2519_v13 }
  0xf4   : > { %v2820_v9 = vsel %vm473_vm3, %v468_v60, %v469_v5  ;;  %2303 = vmatmul.mubr.msk.bf16.gmra.mrb[112].mxu1 %vm344_vm2, %v2482_v7  ;;  %2332 = vmatprep.mubr.msk.bf16.mxu0 %vm2408_vm1, %v2407_v1 }
  0xf5   : > { %2306 = vmatprep.mubr.msk.bf16.mxu1 %vm2408_vm1, %v2407_v1 }
  0xf6   : > { %v420_v11 = vpop.f32.mrb[8].mxu0 }
  0xf7   : > { %v462_v14 = vrot.slane %v420_v11, 5  ;;  %v452_v15 = vpop.f32.mrb[8].mxu1  ;;  %v2086_v16 = vpop.f32.mrb[9].mxu0 }
  0xf8   : > { %v470_v17 = vrot.slane %v452_v15, 5  ;;  %v423_v18 = vpop.f32.mrb[10].mxu0  ;;  %v2102_v13 = vpop.f32.mrb[9].mxu1 }
  0xf9   : > { %v2830_v19 = vsel %vm473_vm3, %v461_v0, %v462_v14  ;;  %v463_v20 = vrot.slane %v423_v18, 5  ;;  %v2087_v21 = vpop.f32.mrb[11].mxu0  ;;  %v455_v22 = vpop.f32.mrb[10].mxu1 }
  0xfa   : > { %v2834_v23 = vsel %vm473_vm3, %v469_v5, %v470_v17  ;;  %v2838_v24 = vsel %vm473_vm3, %v470_v17, %v458_v48  ;;  %v2103_v25 = vpop.f32.mrb[11].mxu1 }
  0xfb   : > { %v2842_v26 = vsel %vm473_vm3, %v462_v14, %v463_v20  ;;  %2333 = vmatmul.mubr.msk.bf16.gmra.mrb[116].mxu0 %vm344_vm2, %v2482_v7 }
  0xfc   : > { %2307 = vmatmul.mubr.msk.bf16.gmra.mrb[116].mxu1 %vm344_vm2, %v2497_v10  ;;  %2336 = vmatprep.mubr.msk.bf16.mxu0 %vm2408_vm1, %v2407_v1 }
  0xfd   : > { %2310 = vmatprep.mubr.msk.bf16.mxu1 %vm2408_vm1, %v2407_v1 }
  0xfe   : > { %v428_v27 = vpop.f32.mrb[12].mxu0 }
  0xff   : > { %v464_v28 = vrot.slane %v428_v27, 5  ;;  %v2852_v29 = vpop.f32.mrb[12].mxu1  ;;  %v2090_v30 = vpop.f32.mrb[13].mxu0 }
 0x100   : > { %v580_v31 = vrot.slane %v2852_v29, 6  ;;  %v2108_v32 = vpop.f32.mrb[13].mxu1  ;;  %v431_v33 = vpop.f32.mrb[14].mxu0 }
 0x101   : > { %v2857_v7 = vsel %vm473_vm3, %v463_v20, %v464_v28  ;;  %v465_v34 = vrot.slane %v431_v33, 5  ;;  %v529_v35 = vpop.f32.mrb[14].mxu1  ;;  %v2091_v36 = vpop.f32.mrb[15].mxu0 }
 0x102   : > { %v581_v37 = vrot.slane %v529_v35, 6  ;;  %v2109_v38 = vpop.f32.mrb[15].mxu1 }
 0x103   : > { %v2864_v39 = vsel %vm473_vm3, %v465_v34, %v466_v46  ;;  %v2868_v40 = vsel %vm473_vm3, %v464_v28, %v465_v34  ;;  %2337 = vmatmul.mubr.msk.bf16.gmra.mrb[120].mxu0 %vm344_vm2, %v2497_v10 }
 0x104   : > { %v605_v42 = vsel %vm593_vm4, %v580_v31, %v581_v37  ;;  %2311 = vmatmul.mubr.msk.bf16.gmra.mrb[120].mxu1 %vm344_vm2, %v2509_v12  ;;  %2340 = vmatprep.mubr.msk.bf16.mxu0 %vm2408_vm1, %v2407_v1 }
 0x105   : > { %v609_v43 = vadd.f32 %v605_v42, %v2788_v54 }
 0x106   : > { %v2881_v44 = vpop.f32.mrb[16].mxu0 }
 0x107   : > { %v534_v45 = vpop.f32.mrb[16].mxu1  ;;  %v2138_v46 = vpop.f32.mrb[17].mxu0  ;;  %v713_v49 = vrot.slane %v2881_v44, 7 }
 0x108   : > { %v582_v47 = vrot.slane %v534_v45, 6  ;;  %v2112_v48 = vpop.f32.mrb[17].mxu1  ;;  %v662_v10 = vpop.f32.mrb[18].mxu0 }
 0x109   : > { %v537_v50 = vpop.f32.mrb[18].mxu1  ;;  %v714_v51 = vrot.slane %v662_v10, 7  ;;  %v2139_v52 = vpop.f32.mrb[19].mxu0 }
 0x10a   : > { %v604_v53 = vsel %vm593_vm4, %v581_v37, %v582_v47  ;;  %v583_v56 = vrot.slane %v537_v50, 6  ;;  %v2113_v57 = vpop.f32.mrb[19].mxu1 }
 0x10b   : > { %v610_v54 = vadd.f32 %v604_v53, %v2806_v63  ;;  %v738_v58 = vsel %vm726_vm5, %v713_v49, %v714_v51  ;;  %2341 = vmatmul.mubr.msk.bf16.gmra.mrb[124].mxu0 %vm344_vm2, %v2509_v12 }
 0x10c   : > { %v603_v59 = vsel %vm593_vm4, %v582_v47, %v583_v56  ;;  %v2896_v60 = vadd.f32 %v738_v58, %v609_v43 }
 0x10d   : > { %v611_v61 = vadd.f32 %v603_v59, %v2814_v8 }
 0x10e   : > { %v667_v62 = vpop.f32.mrb[20].mxu0 }
 0x10f   : > { %v542_v0 = vpop.f32.mrb[20].mxu1  ;;  %v715_v2 = vrot.slane %v667_v62, 7  ;;  %v2142_v3 = vpop.f32.mrb[21].mxu0 }
 0x110   : > { %v584_v63 = vrot.slane %v542_v0, 6  ;;  %v2116_v5 = vpop.f32.mrb[21].mxu1  ;;  %v670_v6 = vpop.f32.mrb[22].mxu0 }
 0x111   : > { %v737_v11 = vsel %vm726_vm5, %v714_v51, %v715_v2  ;;  %v545_v14 = vpop.f32.mrb[22].mxu1  ;;  %v716_v15 = vrot.slane %v670_v6, 7  ;;  %v2143_v12 = vpop.f32.mrb[23].mxu0 }
 0x112   : > { %v602_v16 = vsel %vm593_vm4, %v583_v56, %v584_v63  ;;  %v585_v17 = vrot.slane %v545_v14, 6  ;;  %v2117_v18 = vpop.f32.mrb[23].mxu1  ;;  %v2903_v13 = vadd.f32 %v737_v11, %v610_v54 }
 0x113   : > { %v612_v8 = vadd.f32 %v602_v16, %v2830_v19  ;;  %v736_v20 = vsel %vm726_vm5, %v715_v2, %v716_v15 }
 0x114   : > { %v601_v21 = vsel %vm593_vm4, %v584_v63, %v585_v17  ;;  %v2910_v22 = vadd.f32 %v736_v20, %v611_v61 }
 0x115   : > { %v613_v25 = vadd.f32 %v601_v21, %v2842_v26 }
 0x116   : > { %v675_v27 = vpop.f32.mrb[24].mxu0 }
 0x117   : > { %v550_v28 = vpop.f32.mrb[24].mxu1  ;;  %v717_v30 = vrot.slane %v675_v27, 7  ;;  %v2146_v32 = vpop.f32.mrb[25].mxu0 }
 0x118   : > { %v586_v33 = vrot.slane %v550_v28, 6  ;;  %v2120_v34 = vpop.f32.mrb[25].mxu1  ;;  %v678_v35 = vpop.f32.mrb[26].mxu0 }
 0x119   : > { %v735_v19 = vsel %vm726_vm5, %v716_v15, %v717_v30  ;;  %v553_v36 = vpop.f32.mrb[26].mxu1  ;;  %v718_v37 = vrot.slane %v678_v35, 7  ;;  %v2147_v38 = vpop.f32.mrb[27].mxu0 }
 0x11a   : > { %v600_v42 = vsel %vm593_vm4, %v585_v17, %v586_v33  ;;  %v587_v43 = vrot.slane %v553_v36, 6  ;;  %v2121_v45 = vpop.f32.mrb[27].mxu1  ;;  %v2917_v46 = vadd.f32 %v735_v19, %v612_v8 }
 0x11b   : > { %v614_v26 = vadd.f32 %v600_v42, %v2857_v7  ;;  %v734_v47 = vsel %vm726_vm5, %v717_v30, %v718_v37 }
 0x11c   : > { %v599_v48 = vsel %vm593_vm4, %v586_v33, %v587_v43  ;;  %v2924_v10 = vadd.f32 %v734_v47, %v613_v25 }
 0x11d   : > { %v615_v50 = vadd.f32 %v599_v48, %v2868_v40 }
 0x11e   : > { %v683_v51 = vpop.f32.mrb[28].mxu0 }
 0x11f   : > { %v558_v52 = vpop.f32.mrb[28].mxu1  ;;  %v719_v53 = vrot.slane %v683_v51, 7  ;;  %v2150_v56 = vpop.f32.mrb[29].mxu0 }
 0x120   : > { %v588_v57 = vrot.slane %v558_v52, 6  ;;  %v2124_v54 = vpop.f32.mrb[29].mxu1  ;;  %v686_v58 = vpop.f32.mrb[30].mxu0 }
 0x121   : > { %v733_v7 = vsel %vm726_vm5, %v718_v37, %v719_v53  ;;  %v561_v59 = vpop.f32.mrb[30].mxu1  ;;  %v720_v61 = vrot.slane %v686_v58, 7  ;;  %v2151_v62 = vpop.f32.mrb[31].mxu0 }
 0x122   : > { %v598_v0 = vsel %vm593_vm4, %v587_v43, %v588_v57  ;;  %v589_v2 = vrot.slane %v561_v59, 6  ;;  %v2125_v3 = vpop.f32.mrb[31].mxu1  ;;  %v2931_v63 = vadd.f32 %v733_v7, %v614_v26 }
 0x123   : > { %v616_v40 = vadd.f32 %v598_v0, %v2864_v39  ;;  %v732_v5 = vsel %vm726_vm5, %v719_v53, %v720_v61 }
 0x124   : > { %v597_v6 = vsel %vm593_vm4, %v588_v57, %v589_v2  ;;  %v2938_v11 = vadd.f32 %v732_v5, %v615_v50 }
 0x125   : > { %v617_v14 = vadd.f32 %v597_v6, %v2796_v55 }
 0x126   : > { %v691_v15 = vpop.f32.mrb[32].mxu0 }
 0x127   : > { %v566_v12 = vpop.f32.mrb[32].mxu1  ;;  %v721_v16 = vrot.slane %v691_v15, 7  ;;  %v2154_v17 = vpop.f32.mrb[33].mxu0 }
 0x128   : > { %v590_v18 = vrot.slane %v566_v12, 6  ;;  %v2128_v8 = vpop.f32.mrb[33].mxu1  ;;  %v694_v20 = vpop.f32.mrb[34].mxu0 }
 0x129   : > { %v731_v39 = vsel %vm726_vm5, %v720_v61, %v721_v16  ;;  %v569_v21 = vpop.f32.mrb[34].mxu1  ;;  %v722_v25 = vrot.slane %v694_v20, 7  ;;  %v2155_v27 = vpop.f32.mrb[35].mxu0 }
 0x12a   : > { %v596_v28 = vsel %vm593_vm4, %v589_v2, %v590_v18  ;;  %v591_v30 = vrot.slane %v569_v21, 6  ;;  %v2129_v32 = vpop.f32.mrb[35].mxu1  ;;  %v2945_v33 = vadd.f32 %v731_v39, %v616_v40 }
 0x12b   : > { %v618_v55 = vadd.f32 %v596_v28, %v2810_v4  ;;  %v730_v34 = vsel %vm726_vm5, %v721_v16, %v722_v25 }
 0x12c   : > { %v595_v35 = vsel %vm593_vm4, %v590_v18, %v591_v30  ;;  %v2952_v19 = vadd.f32 %v730_v34, %v617_v14 }
 0x12d   : > { %v619_v36 = vadd.f32 %v595_v35, %v2820_v9 }
 0x12e   : > { %v699_v37 = vpop.f32.mrb[36].mxu0 }
 0x12f   : > { %v574_v38 = vpop.f32.mrb[36].mxu1  ;;  %v723_v42 = vrot.slane %v699_v37, 7  ;;  %v2158_v43 = vpop.f32.mrb[37].mxu0 }
 0x130   : > { %v592_v4 = vrot.slane %v574_v38, 6  ;;  %v702_v9 = vpop.f32.mrb[38].mxu0  ;;  %v2132_v45 = vpop.f32.mrb[37].mxu1 }
 0x131   : > { %v729_v26 = vsel %vm726_vm5, %v722_v25, %v723_v42  ;;  %v724_v47 = vrot.slane %v702_v9, 7  ;;  %v2159_v48 = vpop.f32.mrb[39].mxu0  ;;  %v577_v50 = vpop.f32.mrb[38].mxu1 }
 0x132   : > { %v594_v51 = vsel %vm593_vm4, %v591_v30, %v592_v4  ;;  %v606_v52 = vsel %vm593_vm4, %v592_v4, %v580_v31  ;;  %v2133_v53 = vpop.f32.mrb[39].mxu1  ;;  %v2989_v56 = vadd.f32 %v729_v26, %v618_v55 }
 0x133   : > { %v607_v1 = vadd.f32 %v594_v51, %v2834_v23  ;;  %v608_v57 = vadd.f32 %v606_v52, %v2838_v24  ;;  %v728_v54 = vsel %vm726_vm5, %v723_v42, %v724_v47 }
 0x134   : > { %v2995_v58 = vadd.f32 %v728_v54, %v619_v36 }
 0x136   : > { %v707_v7 = vpop.f32.mrb[40].mxu0 }
 0x137   : > { %v725_v59 = vrot.slane %v707_v7, 7  ;;  %v2997_v61 = vpop.f32.mrb[40].mxu1  ;;  %v2162_v29 = vpop.f32.mrb[41].mxu0 }
 0x138   : > { %v846_v62 = vrot.slane %v2997_v61, 7  ;;  %v2168_v31 = vpop.f32.mrb[41].mxu1  ;;  %v710_v0 = vpop.f32.mrb[42].mxu0 }
 0x139   : > { %v727_v2 = vsel %vm726_vm5, %v724_v47, %v725_v59  ;;  %v739_v23 = vsel %vm726_vm5, %v725_v59, %v713_v49  ;;  %v795_v24 = vpop.f32.mrb[42].mxu1  ;;  %v2163_v3 = vpop.f32.mrb[43].mxu0 }
 0x13a   : > { %v3006_v40 = vadd.f32 %v727_v2, %v607_v1  ;;  %v847_v5 = vrot.slane %v795_v24, 7  ;;  %v2169_v6 = vpop.f32.mrb[43].mxu1  ;;  %v741_v14 = vadd.f32 %v739_v23, %v608_v57 }
 0x13c   : > { %v870_v15 = vsel %vm726_vm5, %v846_v62, %v847_v5 }
 0x13d   : > { %v873_v12 = vadd.f32 %v870_v15, %v741_v14 }
 0x13e   : > { %v3012_v16 = vpop.f32.mrb[44].mxu0 }
 0x13f   : > { %v800_v17 = vpop.f32.mrb[44].mxu1  ;;  %v2198_v44 = vpop.f32.mrb[45].mxu0 }
 0x140   : > { %v848_v18 = vrot.slane %v800_v17, 7  ;;  %v2172_v8 = vpop.f32.mrb[45].mxu1  ;;  %v927_v49 = vpop.f32.mrb[46].mxu0 }
 0x141   : > { %v803_v20 = vpop.f32.mrb[46].mxu1  ;;  %v3014_v39 = vadd.f32 %v927_v49, %v873_v12  ;;  %v2199_v21 = vpop.f32.mrb[47].mxu0 }
 0x142   : > { %v849_v25 = vrot.slane %v803_v20, 7  ;;  %v2173_v27 = vpop.f32.mrb[47].mxu1  ;;  %v869_v28 = vsel %vm726_vm5, %v847_v5, %v848_v18 }
 0x143   : > { %v874_v30 = vadd.f32 %v869_v28, %v2896_v60 }
 0x144   : > { %v868_v32 = vsel %vm726_vm5, %v848_v18, %v849_v25 }
 0x145   : > { %v875_v55 = vadd.f32 %v868_v32, %v2903_v13 }
 0x146   : > { %v932_v34 = vpop.f32.mrb[48].mxu0 }
 0x147   : > { %v808_v35 = vpop.f32.mrb[48].mxu1  ;;  %v3022_v36 = vadd.f32 %v932_v34, %v874_v30  ;;  %v2202_v37 = vpop.f32.mrb[49].mxu0 }
 0x148   : > { %v850_v38 = vrot.slane %v808_v35, 7  ;;  %v2176_v42 = vpop.f32.mrb[49].mxu1  ;;  %v935_v43 = vpop.f32.mrb[50].mxu0 }
 0x149   : > { %v811_v4 = vpop.f32.mrb[50].mxu1  ;;  %v3024_v9 = vadd.f32 %v935_v43, %v875_v55  ;;  %v2203_v45 = vpop.f32.mrb[51].mxu0 }
 0x14a   : > { %v851_v26 = vrot.slane %v811_v4, 7  ;;  %v2177_v47 = vpop.f32.mrb[51].mxu1  ;;  %v867_v60 = vsel %vm726_vm5, %v849_v25, %v850_v38 }
 0x14b   : > { %v876_v48 = vadd.f32 %v867_v60, %v2910_v22 }
 0x14c   : > { %v866_v13 = vsel %vm726_vm5, %v850_v38, %v851_v26 }
 0x14d   : > { %v877_v50 = vadd.f32 %v866_v13, %v2917_v46 }
 0x14e   : > { %v940_v51 = vpop.f32.mrb[52].mxu0 }
 0x14f   : > { %v816_v52 = vpop.f32.mrb[52].mxu1  ;;  %v3032_v53 = vadd.f32 %v940_v51, %v876_v48  ;;  %v2206_v1 = vpop.f32.mrb[53].mxu0 }
 0x150   : > { %v852_v57 = vrot.slane %v816_v52, 7  ;;  %v2180_v54 = vpop.f32.mrb[53].mxu1  ;;  %v943_v7 = vpop.f32.mrb[54].mxu0 }
 0x151   : > { %v819_v59 = vpop.f32.mrb[54].mxu1  ;;  %v3034_v29 = vadd.f32 %v943_v7, %v877_v50  ;;  %v2207_v31 = vpop.f32.mrb[55].mxu0 }
 0x152   : > { %v853_v0 = vrot.slane %v819_v59, 7  ;;  %v2181_v2 = vpop.f32.mrb[55].mxu1  ;;  %v865_v22 = vsel %vm726_vm5, %v851_v26, %v852_v57 }
 0x153   : > { %v878_v23 = vadd.f32 %v865_v22, %v2924_v10 }
 0x154   : > { %v864_v46 = vsel %vm726_vm5, %v852_v57, %v853_v0 }
 0x155   : > { %v879_v24 = vadd.f32 %v864_v46, %v2931_v63 }
 0x156   : > { %v948_v3 = vpop.f32.mrb[56].mxu0 }
 0x157   : > { %v824_v5 = vpop.f32.mrb[56].mxu1  ;;  %v3042_v6 = vadd.f32 %v948_v3, %v878_v23  ;;  %v2210_v14 = vpop.f32.mrb[57].mxu0 }
 0x158   : > { %v854_v15 = vrot.slane %v824_v5, 7  ;;  %v2184_v12 = vpop.f32.mrb[57].mxu1  ;;  %v951_v17 = vpop.f32.mrb[58].mxu0 }
 0x159   : > { %v827_v44 = vpop.f32.mrb[58].mxu1  ;;  %v3044_v18 = vadd.f32 %v951_v17, %v879_v24  ;;  %v2211_v8 = vpop.f32.mrb[59].mxu0 }
 0x15a   : > { %v855_v49 = vrot.slane %v827_v44, 7  ;;  %v2185_v20 = vpop.f32.mrb[59].mxu1  ;;  %v863_v10 = vsel %vm726_vm5, %v853_v0, %v854_v15 }
 0x15b   : > { %v880_v21 = vadd.f32 %v863_v10, %v2938_v11 }
 0x15c   : > { %v862_v63 = vsel %vm726_vm5, %v854_v15, %v855_v49 }
 0x15d   : > { %v881_v25 = vadd.f32 %v862_v63, %v2945_v33 }
 0x15e   : > { %v956_v27 = vpop.f32.mrb[60].mxu0 }
 0x15f   : > { %v832_v28 = vpop.f32.mrb[60].mxu1  ;;  %v3052_v30 = vadd.f32 %v956_v27, %v880_v21  ;;  %v2214_v32 = vpop.f32.mrb[61].mxu0 }
 0x160   : > { %v856_v55 = vrot.slane %v832_v28, 7  ;;  %v2188_v34 = vpop.f32.mrb[61].mxu1  ;;  %v959_v35 = vpop.f32.mrb[62].mxu0 }
 0x161   : > { %v835_v37 = vpop.f32.mrb[62].mxu1  ;;  %v3054_v38 = vadd.f32 %v959_v35, %v881_v25  ;;  %v2215_v42 = vpop.f32.mrb[63].mxu0 }
 0x162   : > { %v857_v43 = vrot.slane %v835_v37, 7  ;;  %v2189_v4 = vpop.f32.mrb[63].mxu1  ;;  %v861_v11 = vsel %vm726_vm5, %v855_v49, %v856_v55 }
 0x163   : > { %v882_v45 = vadd.f32 %v861_v11, %v2952_v19 }
 0x164   : > { %v860_v33 = vsel %vm726_vm5, %v856_v55, %v857_v43 }
 0x165   : > { %v883_v26 = vadd.f32 %v860_v33, %v2989_v56 }
 0x166   : > { %v964_v47 = vpop.f32.mrb[64].mxu0 }
 0x167   : > { %v840_v60 = vpop.f32.mrb[64].mxu1  ;;  %v3062_v48 = vadd.f32 %v964_v47, %v882_v45  ;;  %v2218_v13 = vpop.f32.mrb[65].mxu0 }
 0x168   : > { %v858_v50 = vrot.slane %v840_v60, 7  ;;  %v967_v51 = vpop.f32.mrb[66].mxu0  ;;  %v2192_v52 = vpop.f32.mrb[65].mxu1 }
 0x169   : > { %v3064_v1 = vadd.f32 %v967_v51, %v883_v26  ;;  %v2219_v57 = vpop.f32.mrb[67].mxu0  ;;  %v843_v54 = vpop.f32.mrb[66].mxu1 }
 0x16a   : > { %v871_v19 = vsel %vm726_vm5, %v858_v50, %v846_v62  ;;  %v2193_v7 = vpop.f32.mrb[67].mxu1  ;;  %v859_v56 = vsel %vm726_vm5, %v857_v43, %v858_v50 }
 0x16b   : > { %v872_v59 = vadd.f32 %v871_v19, %v3006_v40  ;;  %v884_v31 = vadd.f32 %v859_v56, %v2995_v58 }
 0x16d   : > { %v978_v0 = vadd.f32 %v3012_v16, %v872_v59 }
 0x16e   : > { %v972_v2 = vpop.f32.mrb[68].mxu0 }
 0x16f   : > { %v3075_v22 = vadd.f32 %v972_v2, %v884_v31  ;;  %v3077_v23 = vpop.f32.mrb[68].mxu1  ;;  %v2222_v46 = vpop.f32.mrb[69].mxu0 }
 0x170   : > { %v1084_v61 = vrot.slane %v3077_v23, 1  ;;  %v2228_v24 = vpop.f32.mrb[69].mxu1  ;;  %v975_v62 = vpop.f32.mrb[70].mxu0 }
 0x171   : > { %v1033_v3 = vpop.f32.mrb[70].mxu1  ;;  %v2223_v5 = vpop.f32.mrb[71].mxu0 }
 0x172   : > { %v1085_v14 = vrot.slane %v1033_v3, 1  ;;  %v2229_v40 = vpop.f32.mrb[71].mxu1 }
 0x174   : > { %v1109_v58 = vsel %vm1097_vm7, %v1084_v61, %v1085_v14 }
 0x175   : > { %v1111_v16 = vadd.f32 %v1109_v58, %v978_v0 }
 0x176   : > { %v3085_v15 = vpop.f32.mrb[72].mxu0 }
 0x177   : > { %v1038_v12 = vpop.f32.mrb[72].mxu1  ;;  %v2258_v17 = vpop.f32.mrb[73].mxu0  ;;  %v1217_v20 = vrot.slane %v3085_v15, 1 }
 0x178   : > { %v1086_v44 = vrot.slane %v1038_v12, 1  ;;  %v2232_v8 = vpop.f32.mrb[73].mxu1  ;;  %v1166_v49 = vpop.f32.mrb[74].mxu0 }
 0x179   : > { %v1041_v10 = vpop.f32.mrb[74].mxu1  ;;  %v1218_v21 = vrot.slane %v1166_v49, 1  ;;  %v2259_v63 = vpop.f32.mrb[75].mxu0 }
 0x17a   : > { %v1108_v25 = vsel %vm1097_vm7, %v1085_v14, %v1086_v44  ;;  %v1087_v27 = vrot.slane %v1041_v10, 1  ;;  %v2233_v28 = vpop.f32.mrb[75].mxu1  ;;  %v3128_v10 = vpop.permute.xlu0 %1626 }
 0x17b   : > { %v1112_v32 = vadd.f32 %v1108_v25, %v3014_v39  ;;  %v3095_v55 = vsel %vm1097_vm7, %v1217_v20, %v1218_v21 }
 0x17c   : > { %v1107_v34 = vsel %vm1097_vm7, %v1086_v44, %v1087_v27 }
 0x17d   : > { %v1113_v35 = vadd.f32 %v1107_v34, %v3022_v36 }
 0x17e   : > { %v1171_v37 = vpop.f32.mrb[76].mxu0 }
 0x17f   : > { %v1046_v42 = vpop.f32.mrb[76].mxu1  ;;  %v1219_v43 = vrot.slane %v1171_v37, 1  ;;  %v2262_v4 = vpop.f32.mrb[77].mxu0 }
 0x180   : > { %v1088_v11 = vrot.slane %v1046_v42, 1  ;;  %v2236_v45 = vpop.f32.mrb[77].mxu1  ;;  %v1174_v33 = vpop.f32.mrb[78].mxu0 }
 0x181   : > { %v1240_v39 = vsel %vm1097_vm7, %v1218_v21, %v1219_v43  ;;  %v1049_v26 = vpop.f32.mrb[78].mxu1  ;;  %v1220_v47 = vrot.slane %v1174_v33, 1  ;;  %v2263_v60 = vpop.f32.mrb[79].mxu0 }
 0x182   : > { %v1106_v13 = vsel %vm1097_vm7, %v1087_v27, %v1088_v11  ;;  %v3104_v50 = vadd.f32 %v1240_v39, %v1111_v16  ;;  %v1089_v51 = vrot.slane %v1049_v26, 1  ;;  %v2237_v36 = vpop.f32.mrb[79].mxu1  ;;  %v3144_v60 = vpop.permute.xlu0 %1631 }
 0x183   : > { %v1114_v52 = vadd.f32 %v1106_v13, %v3024_v9  ;;  %v1239_v57 = vsel %vm1097_vm7, %v1219_v43, %v1220_v47 }
 0x184   : > { %v1105_v54 = vsel %vm1097_vm7, %v1088_v11, %v1089_v51  ;;  %v3111_v19 = vadd.f32 %v1239_v57, %v1112_v32 }
 0x185   : > { %v1115_v7 = vadd.f32 %v1105_v54, %v3032_v53 }
 0x186   : > { %v1179_v56 = vpop.f32.mrb[80].mxu0 }
 0x187   : > { %v1054_v59 = vpop.f32.mrb[80].mxu1  ;;  %v1221_v31 = vrot.slane %v1179_v56, 1  ;;  %v2266_v0 = vpop.f32.mrb[81].mxu0 }
 0x188   : > { %v1090_v2 = vrot.slane %v1054_v59, 1  ;;  %v2240_v46 = vpop.f32.mrb[81].mxu1  ;;  %v1182_v24 = vpop.f32.mrb[82].mxu0 }
 0x189   : > { %v1238_v9 = vsel %vm1097_vm7, %v1220_v47, %v1221_v31  ;;  %v1057_v62 = vpop.f32.mrb[82].mxu1  ;;  %v1222_v3 = vrot.slane %v1182_v24, 1  ;;  %v2267_v5 = vpop.f32.mrb[83].mxu0 }
 0x18a   : > { %v1104_v14 = vsel %vm1097_vm7, %v1089_v51, %v1090_v2  ;;  %v3118_v40 = vadd.f32 %v1238_v9, %v1113_v35  ;;  %v1091_v58 = vrot.slane %v1057_v62, 1  ;;  %v2241_v53 = vpop.f32.mrb[83].mxu1 }
 0x18b   : > { %v1116_v16 = vadd.f32 %v1104_v14, %v3034_v29  ;;  %v1237_v12 = vsel %vm1097_vm7, %v1221_v31, %v1222_v3  ;;  %v3160_v14 = vpop.permute.xlu0 %1646 }
 0x18c   : > { %v1103_v17 = vsel %vm1097_vm7, %v1090_v2, %v1091_v58  ;;  %v3125_v44 = vadd.f32 %v1237_v12, %v1114_v52 }
 0x18d   : > { %v1117_v8 = vadd.f32 %v1103_v17, %v3042_v6 }
 0x18e   : > { %v1187_v49 = vpop.f32.mrb[84].mxu0 }
 0x18f   : > { %v1062_v21 = vpop.f32.mrb[84].mxu1  ;;  %v1223_v63 = vrot.slane %v1187_v49, 1  ;;  %v2270_v25 = vpop.f32.mrb[85].mxu0 }
 0x190   : > { %v1092_v27 = vrot.slane %v1062_v21, 1  ;;  %v2244_v28 = vpop.f32.mrb[85].mxu1  ;;  %v1190_v32 = vpop.f32.mrb[86].mxu0 }
 0x191   : > { %v1236_v29 = vsel %vm1097_vm7, %v1222_v3, %v1223_v63  ;;  %v1065_v34 = vpop.f32.mrb[86].mxu1  ;;  %v1224_v35 = vrot.slane %v1190_v32, 1  ;;  %v2271_v37 = vpop.f32.mrb[87].mxu0 }
 0x192   : > { %v1102_v42 = vsel %vm1097_vm7, %v1091_v58, %v1092_v27  ;;  %v3134_v43 = vadd.f32 %v1236_v29, %v1115_v7  ;;  %v1093_v6 = vrot.slane %v1065_v34, 1  ;;  %v2245_v4 = vpop.f32.mrb[87].mxu1 }
 0x193   : > { %v1118_v11 = vadd.f32 %v1102_v42, %v3044_v18  ;;  %v1235_v45 = vsel %vm1097_vm7, %v1223_v63, %v1224_v35 }
 0x194   : > { %v1101_v33 = vsel %vm1097_vm7, %v1092_v27, %v1093_v6  ;;  %v3141_v39 = vadd.f32 %v1235_v45, %v1116_v16 }
 0x195   : > { %v1119_v26 = vadd.f32 %v1101_v33, %v3052_v30 }
 0x196   : > { %v1195_v47 = vpop.f32.mrb[88].mxu0 }
 0x197   : > { %v1070_v13 = vpop.f32.mrb[88].mxu1  ;;  %v1225_v51 = vrot.slane %v1195_v47, 1  ;;  %v2274_v36 = vpop.f32.mrb[89].mxu0 }
 0x198   : > { %v1094_v52 = vrot.slane %v1070_v13, 1  ;;  %v2248_v57 = vpop.f32.mrb[89].mxu1  ;;  %v1198_v54 = vpop.f32.mrb[90].mxu0 }
 0x199   : > { %v1234_v18 = vsel %vm1097_vm7, %v1224_v35, %v1225_v51  ;;  %v1073_v7 = vpop.f32.mrb[90].mxu1  ;;  %v1226_v56 = vrot.slane %v1198_v54, 1  ;;  %v2275_v59 = vpop.f32.mrb[91].mxu0 }
 0x19a   : > { %v1100_v31 = vsel %vm1097_vm7, %v1093_v6, %v1094_v52  ;;  %v3150_v0 = vadd.f32 %v1234_v18, %v1117_v8  ;;  %v1095_v30 = vrot.slane %v1073_v7, 1  ;;  %v2249_v2 = vpop.f32.mrb[91].mxu1  ;;  %v3179_v6 = vpop.permute.xlu0 %1656 }
 0x19b   : > { %v1120_v46 = vadd.f32 %v1100_v31, %v3054_v38  ;;  %v1233_v24 = vsel %vm1097_vm7, %v1225_v51, %v1226_v56 }
 0x19c   : > { %v1099_v9 = vsel %vm1097_vm7, %v1094_v52, %v1095_v30  ;;  %v3157_v62 = vadd.f32 %v1233_v24, %v1118_v11 }
 0x19d   : > { %v1121_v3 = vadd.f32 %v1099_v9, %v3062_v48 }
 0x19e   : > { %v1203_v5 = vpop.f32.mrb[92].mxu0  ;;  %v3201_v54 = vpop.permute.xlu0 %1666 }
 0x19f   : > { %v1078_v58 = vpop.f32.mrb[92].mxu1  ;;  %v1227_v53 = vrot.slane %v1203_v5, 1  ;;  %v2278_v16 = vpop.f32.mrb[93].mxu0 }
 0x1a0   : > { %v1096_v12 = vrot.slane %v1078_v58, 1  ;;  %v1206_v17 = vpop.f32.mrb[94].mxu0  ;;  %v2252_v8 = vpop.f32.mrb[93].mxu1 }
 0x1a1   : > { %v1232_v38 = vsel %vm1097_vm7, %v1226_v56, %v1227_v53  ;;  %v1228_v49 = vrot.slane %v1206_v17, 1  ;;  %v2279_v21 = vpop.f32.mrb[95].mxu0  ;;  %v1081_v63 = vpop.f32.mrb[94].mxu1 }
 0x1a2   : > { %v1098_v25 = vsel %vm1097_vm7, %v1095_v30, %v1096_v12  ;;  %v1110_v48 = vsel %vm1097_vm7, %v1096_v12, %v1084_v61  ;;  %v3170_v27 = vadd.f32 %v1232_v38, %v1119_v26  ;;  %v2253_v28 = vpop.f32.mrb[95].mxu1 }
 0x1a3   : > { %v1122_v32 = vadd.f32 %v1098_v25, %v3064_v1  ;;  %v1123_v29 = vadd.f32 %v1110_v48, %v3075_v22  ;;  %v1231_v34 = vsel %vm1097_vm7, %v1227_v53, %v1228_v49  ;;  %v1534_v53 = vld [vmem:[#allocation2 + $0x60] sm:$0xff] }
 0x1a4   : > { %v3176_v35 = vadd.f32 %v1231_v34, %v1120_v46 }
 0x1a5   : > { %v1255_v37 = vadd.f32 %v3095_v55, %v1123_v29  ;;  %v1522_v29 = vld [vmem:[#allocation2] sm:$0xff] }
 0x1a6   : > { %v1211_v42 = vpop.f32.mrb[96].mxu0 }
 0x1a7   : > { %v1229_v23 = vrot.slane %v1211_v42, 1  ;;  %v3181_v4 = vpop.f32.mrb[96].mxu1  ;;  %v2282_v61 = vpop.f32.mrb[97].mxu0 }
 0x1a8   : > { %v1349_v11 = vrot.slane %v3181_v4, 2  ;;  %v2288_v45 = vpop.f32.mrb[97].mxu1  ;;  %v1214_v1 = vpop.f32.mrb[98].mxu0 }
 0x1a9   : > { %v1230_v22 = vsel %vm1097_vm7, %v1228_v49, %v1229_v23  ;;  %v1242_v33 = vsel %vm1097_vm7, %v1229_v23, %v1217_v20  ;;  %v1298_v55 = vpop.f32.mrb[98].mxu1  ;;  %v2283_v26 = vpop.f32.mrb[99].mxu0 }
 0x1aa   : > { %v3191_v47 = vadd.f32 %v1230_v22, %v1121_v3  ;;  %v3193_v13 = vadd.f32 %v1242_v33, %v1122_v32  ;;  %v1350_v51 = vrot.slane %v1298_v55, 2  ;;  %v2289_v36 = vpop.f32.mrb[99].mxu1  ;;  %v3215_v49 = vpop.permute.xlu0 %1676  ;;  %v1523_v33 = vld [vmem:[#allocation2 + $0x8] sm:$0xff] }
 0x1ac   : > { %v1374_v52 = vsel %vm1362_vm8, %v1349_v11, %v1350_v51 }
 0x1ad   : > { %v1388_v57 = vadd.f32 %v1374_v52, %v1255_v37  ;;  %v3231_v52 = vld [vmem:[%s3356_s2] ss:$0 sm:$0xff] }
 0x1ae   : > { %v3199_v15 = vpop.f32.mrb[100].mxu0 }
 0x1af   : > { %v1303_v20 = vpop.f32.mrb[100].mxu1  ;;  %v2318_v18 = vpop.f32.mrb[101].mxu0  ;;  %v1482_v31 = vrot.slane %v3199_v15, 3 }
 0x1b0   : > { %v1351_v7 = vrot.slane %v1303_v20, 2  ;;  %v2292_v56 = vpop.f32.mrb[101].mxu1  ;;  %v1431_v59 = vpop.f32.mrb[102].mxu0 }
 0x1b1   : > { %v1306_v30 = vpop.f32.mrb[102].mxu1  ;;  %v1483_v2 = vrot.slane %v1431_v59, 3  ;;  %v2319_v46 = vpop.f32.mrb[103].mxu0 }
 0x1b2   : > { %v1373_v24 = vsel %vm1362_vm8, %v1350_v51, %v1351_v7  ;;  %v1352_v9 = vrot.slane %v1306_v30, 2  ;;  %v2293_v3 = vpop.f32.mrb[103].mxu1  ;;  %v1687_v20 = vpop.permute.xlu0 %1686 }
 0x1b3   : > { %v1376_v5 = vadd.f32 %v1373_v24, %v3104_v50  ;;  %v1507_v58 = vsel %vm1495_vm9, %v1482_v31, %v1483_v2 }
 0x1b4   : > { %v1372_v16 = vsel %vm1362_vm8, %v1351_v7, %v1352_v9  ;;  %v1521_v12 = vadd.f32 %v1507_v58, %v1388_v57 }
 0x1b5   : > { %v1377_v17 = vadd.f32 %v1372_v16, %v3111_v19 }
 0x1b6   : > { %v1547_v8 = vadd.f32 %v1534_v53, %v1521_v12  ;;  %v1436_v38 = vpop.f32.mrb[104].mxu0 }
 0x1b7   : > { %v1311_v21 = vpop.f32.mrb[104].mxu1  ;;  %v1484_v63 = vrot.slane %v1436_v38, 3  ;;  %v2322_v25 = vpop.f32.mrb[105].mxu0 }
 0x1b8   : > { %1561 = vst.msk [vmem:[#allocation2 + $0x60] sm:$0xff] %vm283_vm6, %v1547_v8  ;;  %v1353_v50 = vrot.slane %v1311_v21, 2  ;;  %v2296_v48 = vpop.f32.mrb[105].mxu1  ;;  %v1439_v28 = vpop.f32.mrb[106].mxu0 }
 0x1b9   : > { %v1506_v32 = vsel %vm1495_vm9, %v1483_v2, %v1484_v63  ;;  %v1314_v34 = vpop.f32.mrb[106].mxu1  ;;  %v1485_v37 = vrot.slane %v1439_v28, 3  ;;  %v2323_v42 = vpop.f32.mrb[107].mxu0 }
 0x1ba   : > { %v1371_v19 = vsel %vm1362_vm8, %v1352_v9, %v1353_v50  ;;  %v1509_v23 = vadd.f32 %v1506_v32, %v1376_v5  ;;  %v1354_v61 = vrot.slane %v1314_v34, 2  ;;  %v2297_v45 = vpop.f32.mrb[107].mxu1  ;;  %v1524_v9 = vld [vmem:[#allocation2 + $0x10] sm:$0xff] }
 0x1bb   : > { %v1378_v1 = vadd.f32 %v1371_v19, %v3118_v40  ;;  %v1505_v22 = vsel %vm1495_vm9, %v1484_v63, %v1485_v37  ;;  %v1525_v63 = vld [vmem:[#allocation2 + $0x18] sm:$0xff] }
 0x1bc   : > { %v1535_v55 = vadd.f32 %v1522_v29, %v1509_v23  ;;  %v1370_v26 = vsel %vm1362_vm8, %v1353_v50, %v1354_v61  ;;  %v1510_v51 = vadd.f32 %v1505_v22, %v1377_v17 }
 0x1bd   : > { %v1379_v36 = vadd.f32 %v1370_v26, %v3125_v44 }
 0x1be   : > { %1549 = vst.msk [vmem:[#allocation2] sm:$0xff] %vm283_vm6, %v1535_v55  ;;  %v1536_v57 = vadd.f32 %v1523_v33, %v1510_v51  ;;  %v1444_v40 = vpop.f32.mrb[108].mxu0  ;;  %v1526_v51 = vld [vmem:[#allocation2 + $0x20] sm:$0xff] }
 0x1bf   : > { %v1319_v18 = vpop.f32.mrb[108].mxu1  ;;  %v1486_v7 = vrot.slane %v1444_v40, 3  ;;  %v2326_v56 = vpop.f32.mrb[109].mxu0  ;;  %v1577_v59 = vld [vmem:[#allocation2 + $0x60] sm:$0xff] }
 0x1c0   : > { %1550 = vst.msk [vmem:[#allocation2 + $0x8] sm:$0xff] %vm283_vm6, %v1536_v57  ;;  %v1355_v30 = vrot.slane %v1319_v18, 2  ;;  %v2300_v2 = vpop.f32.mrb[109].mxu1  ;;  %v1447_v46 = vpop.f32.mrb[110].mxu0  ;;  %v1597_v44 = vadd.f32 %v3231_v52, %v1577_v59 }
 0x1c1   : > { %v1504_v24 = vsel %vm1495_vm9, %v1485_v37, %v1486_v7  ;;  %v1322_v3 = vpop.f32.mrb[110].mxu1  ;;  %v1487_v5 = vrot.slane %v1447_v46, 3  ;;  %v2327_v58 = vpop.f32.mrb[111].mxu0 }
 0x1c2   : > { %v1369_v53 = vsel %vm1362_vm8, %v1354_v61, %v1355_v30  ;;  %v1511_v16 = vadd.f32 %v1504_v24, %v1378_v1  ;;  %v1356_v12 = vrot.slane %v1322_v3, 2  ;;  %v1610_v17 = vmax.f32 %v1597_v44, 0.0  ;;  %v2301_v8 = vpop.f32.mrb[111].mxu1  ;;  %v1527_v44 = vld [vmem:[#allocation2 + $0x28] sm:$0xff]  ;;  %v1637_v58 = vpop.permute.xlu1 %1636 }
 0x1c3   : > { %v1380_v38 = vadd.f32 %v1369_v53, %v3134_v43  ;;  %v1503_v21 = vsel %vm1495_vm9, %v1486_v7, %v1487_v5 }
 0x1c4   : > { %v1537_v25 = vadd.f32 %v1524_v9, %v1511_v16  ;;  %v1368_v50 = vsel %vm1362_vm8, %v1355_v30, %v1356_v12  ;;  %v1512_v48 = vadd.f32 %v1503_v21, %v1379_v36  ;;  %v1701_v28 = vmul.f32 %v1687_v20, %v1610_v17 }
 0x1c5   : > { %v1565_v32 = vld [vmem:[#allocation2] sm:$0xff]  ;;  %v1381_v29 = vadd.f32 %v1368_v50, %v3141_v39 }
 0x1c6   : > { %1551 = vst.msk [vmem:[#allocation2 + $0x10] sm:$0xff] %vm283_vm6, %v1537_v25  ;;  %v1538_v43 = vadd.f32 %v1525_v63, %v1512_v48  ;;  %v1585_v34 = vadd.f32 %v3231_v52, %v1565_v32  ;;  %v2001_v37 = vpack.c.bf16 %v1701_v28, %v1701_v28  ;;  %v1452_v42 = vpop.f32.mrb[112].mxu0 }
 0x1c7   : > { %v1566_v19 = vld [vmem:[#allocation2 + $0x8] sm:$0xff]  ;;  %v1327_v23 = vpop.f32.mrb[112].mxu1  ;;  %v1488_v61 = vrot.slane %v1452_v42, 3  ;;  %v2330_v45 = vpop.f32.mrb[113].mxu0 }
 0x1c8   : > { %1552 = vst.msk [vmem:[#allocation2 + $0x18] sm:$0xff] %vm283_vm6, %v1538_v43  ;;  %v1586_v39 = vadd.f32 %v3231_v52, %v1566_v19  ;;  %v1598_v1 = vmax.f32 %v1585_v34, 0.0  ;;  %v1357_v22 = vrot.slane %v1327_v23, 2  ;;  %v2304_v33 = vpop.f32.mrb[113].mxu1  ;;  %v1455_v55 = vpop.f32.mrb[114].mxu0 }
 0x1c9   : > { %1768 = vst.msk [vmem:[%s3251_s29 + $0x30] sm:$0xf] %vm1755_vm10, %v2001_v37  ;;  %v1502_v26 = vsel %vm1495_vm9, %v1487_v5, %v1488_v61  ;;  %v1330_v36 = vpop.f32.mrb[114].mxu1  ;;  %v1489_v57 = vrot.slane %v1455_v55, 3  ;;  %v2331_v40 = vpop.f32.mrb[115].mxu0  ;;  %v1529_v55 = vld [vmem:[#allocation2 + $0x38] sm:$0xff] }
 0x1ca   : > { %v1599_v20 = vmax.f32 %v1586_v39, 0.0  ;;  %v1689_v18 = vmul.f32 %v3128_v10, %v1598_v1  ;;  %v1367_v7 = vsel %vm1362_vm8, %v1356_v12, %v1357_v22  ;;  %v1513_v56 = vadd.f32 %v1502_v26, %v1380_v38  ;;  %v2305_v59 = vpop.f32.mrb[115].mxu1  ;;  %v1642_v39 = vpop.permute.xlu1 %1641 }
 0x1cb   : > { %v1382_v30 = vadd.f32 %v1367_v7, %v3150_v0  ;;  %v1358_v2 = vrot.slane %v1330_v36, 2  ;;  %v1501_v46 = vsel %vm1495_vm9, %v1488_v61, %v1489_v57 }
 0x1cc   : > { %v1690_v24 = vmul.f32 %v3144_v60, %v1599_v20  ;;  %v1989_v9 = vpack.c.bf16 %v1689_v18, %v1689_v18  ;;  %v1539_v3 = vadd.f32 %v1526_v51, %v1513_v56  ;;  %v1514_v5 = vadd.f32 %v1501_v46, %v1381_v29  ;;  %v1528_v29 = vld [vmem:[#allocation2 + $0x30] sm:$0xff] }
 0x1cd   : > { %v1366_v10 = vsel %vm1362_vm8, %v1357_v22, %v1358_v2  ;;  %v1567_v53 = vld [vmem:[#allocation2 + $0x10] sm:$0xff] }
 0x1ce   : > { %v1990_v16 = vpack.c.bf16 %v1690_v24, %v1690_v24  ;;  %1756 = vst.msk [vmem:[%s3251_s29] sm:$0xf] %vm1755_vm10, %v1989_v9  ;;  %v1383_v0 = vadd.f32 %v1366_v10, %v3157_v62  ;;  %v1540_v12 = vadd.f32 %v1527_v44, %v1514_v5  ;;  %v1587_v17 = vadd.f32 %v3231_v52, %v1567_v53  ;;  %v1460_v60 = vpop.f32.mrb[116].mxu0 }
 0x1cf   : > { %1553 = vst.msk [vmem:[#allocation2 + $0x20] sm:$0xff] %vm283_vm6, %v1539_v3  ;;  %v1568_v8 = vld [vmem:[#allocation2 + $0x18] sm:$0xff]  ;;  %v1335_v38 = vpop.f32.mrb[116].mxu1  ;;  %v1490_v21 = vrot.slane %v1460_v60, 3  ;;  %v2334_v63 = vpop.f32.mrb[117].mxu0 }
 0x1d0   : > { %1757 = vst.msk [vmem:[%s3251_s29 + $0x4] sm:$0xf] %vm1755_vm10, %v1990_v16  ;;  %v1600_v25 = vmax.f32 %v1587_v17, 0.0  ;;  %v1588_v50 = vadd.f32 %v3231_v52, %v1568_v8  ;;  %v1359_v48 = vrot.slane %v1335_v38, 2  ;;  %v2308_v28 = vpop.f32.mrb[117].mxu1  ;;  %v1463_v32 = vpop.f32.mrb[118].mxu0 }
 0x1d1   : > { %1554 = vst.msk [vmem:[#allocation2 + $0x28] sm:$0xff] %vm283_vm6, %v1540_v12  ;;  %v1500_v62 = vsel %vm1495_vm9, %v1489_v57, %v1490_v21  ;;  %v1338_v43 = vpop.f32.mrb[118].mxu1  ;;  %v1491_v34 = vrot.slane %v1463_v32, 3  ;;  %v2335_v37 = vpop.f32.mrb[119].mxu0  ;;  %v1530_v8 = vld [vmem:[#allocation2 + $0x40] sm:$0xff] }
 0x1d2   : > { %v1691_v42 = vmul.f32 %v1637_v58, %v1600_v25  ;;  %v1601_v19 = vmax.f32 %v1588_v50, 0.0  ;;  %v1365_v23 = vsel %vm1362_vm8, %v1358_v2, %v1359_v48  ;;  %v1515_v61 = vadd.f32 %v1500_v62, %v1382_v30  ;;  %v2309_v45 = vpop.f32.mrb[119].mxu1 }
 0x1d3   : > { %v1384_v1 = vadd.f32 %v1365_v23, %v3170_v27  ;;  %v1360_v22 = vrot.slane %v1338_v43, 2  ;;  %v1499_v33 = vsel %vm1495_vm9, %v1490_v21, %v1491_v34  ;;  %v1652_v21 = vpop.permute.xlu1 %1651 }
 0x1d4   : > { %v1991_v26 = vpack.c.bf16 %v1691_v42, %v1691_v42  ;;  %v1692_v51 = vmul.f32 %v1642_v39, %v1601_v19  ;;  %v1541_v36 = vadd.f32 %v1528_v29, %v1515_v61  ;;  %v1516_v57 = vadd.f32 %v1499_v33, %v1383_v0 }
 0x1d5   : > { %v1364_v20 = vsel %vm1362_vm8, %v1359_v48, %v1360_v22  ;;  %v1531_v48 = vld [vmem:[#allocation2 + $0x48] sm:$0xff] }
 0x1d6   : > { %v1569_v40 = vld [vmem:[#allocation2 + $0x20] sm:$0xff]  ;;  %1758 = vst.msk [vmem:[%s3251_s29 + $0x8] sm:$0xf] %vm1755_vm10, %v1991_v26  ;;  %v1992_v7 = vpack.c.bf16 %v1692_v51, %v1692_v51  ;;  %v1385_v27 = vadd.f32 %v1364_v20, %v3176_v35  ;;  %v1542_v56 = vadd.f32 %v1529_v55, %v1516_v57  ;;  %v1468_v59 = vpop.f32.mrb[120].mxu0 }
 0x1d7   : > { %v1589_v18 = vadd.f32 %v3231_v52, %v1569_v40  ;;  %1555 = vst.msk [vmem:[#allocation2 + $0x30] sm:$0xff] %vm283_vm6, %v1541_v36  ;;  %v1343_v2 = vpop.f32.mrb[120].mxu1  ;;  %v1492_v46 = vrot.slane %v1468_v59, 3  ;;  %v2338_v44 = vpop.f32.mrb[121].mxu0 }
 0x1d8   : > { %v1570_v30 = vld [vmem:[#allocation2 + $0x28] sm:$0xff]  ;;  %1759 = vst.msk [vmem:[%s3251_s29 + $0xc] sm:$0xf] %vm1755_vm10, %v1992_v7  ;;  %v1361_v3 = vrot.slane %v1343_v2, 2  ;;  %v1471_v5 = vpop.f32.mrb[122].mxu0  ;;  %v2312_v10 = vpop.f32.mrb[121].mxu1 }
 0x1d9   : > { %v1602_v24 = vmax.f32 %v1589_v18, 0.0  ;;  %1556 = vst.msk [vmem:[#allocation2 + $0x38] sm:$0xff] %vm283_vm6, %v1542_v56  ;;  %v1590_v9 = vadd.f32 %v3231_v52, %v1570_v30  ;;  %v1498_v58 = vsel %vm1495_vm9, %v1491_v34, %v1492_v46  ;;  %v1493_v35 = vrot.slane %v1471_v5, 3  ;;  %v2339_v53 = vpop.f32.mrb[123].mxu0  ;;  %v1346_v16 = vpop.f32.mrb[122].mxu1 }
 0x1da   : > { %v1363_v17 = vsel %vm1362_vm8, %v1360_v22, %v1361_v3  ;;  %v1375_v60 = vsel %vm1362_vm8, %v1361_v3, %v1349_v11  ;;  %v2313_v38 = vpop.f32.mrb[123].mxu1  ;;  %v1517_v50 = vadd.f32 %v1498_v58, %v1384_v1  ;;  %v1532_v1 = vld [vmem:[#allocation2 + $0x50] sm:$0xff]  ;;  %v1533_v22 = vld [vmem:[#allocation2 + $0x58] sm:$0xff]  ;;  %v1662_v57 = vpop.permute.xlu1 %1661 }
 0x1db   : > { %v1693_v0 = vmul.f32 %v3160_v14, %v1602_v24  ;;  %v1603_v12 = vmax.f32 %v1590_v9, 0.0  ;;  %v1386_v63 = vadd.f32 %v1363_v17, %v3191_v47  ;;  %v1387_v25 = vadd.f32 %v1375_v60, %v3193_v13 }
 0x1dc   : > { %v1497_v14 = vsel %vm1495_vm9, %v1492_v46, %v1493_v35  ;;  %v1543_v29 = vadd.f32 %v1530_v8, %v1517_v50 }
 0x1dd   : > { %v1993_v28 = vpack.c.bf16 %v1693_v0, %v1693_v0  ;;  %v1694_v32 = vmul.f32 %v1652_v21, %v1603_v12  ;;  %v1518_v62 = vadd.f32 %v1497_v14, %v1385_v27 }
 0x1de   : > { %v1571_v4 = vld [vmem:[#allocation2 + $0x30] sm:$0xff]  ;;  %v1476_v47 = vpop.f32.mrb[124].mxu0  ;;  %1557 = vst.msk [vmem:[#allocation2 + $0x40] sm:$0xff] %vm283_vm6, %v1543_v29  ;;  %v1672_v2 = vpop.permute.xlu1 %1671 }
 0x1df   : > { %1760 = vst.msk [vmem:[%s3251_s29 + $0x10] sm:$0xf] %vm1755_vm10, %v1993_v28  ;;  %v1591_v11 = vadd.f32 %v3231_v52, %v1571_v4  ;;  %v1994_v43 = vpack.c.bf16 %v1694_v32, %v1694_v32  ;;  %v1544_v34 = vadd.f32 %v1531_v48, %v1518_v62  ;;  %v1494_v13 = vrot.slane %v1476_v47, 3  ;;  %v2342_v42 = vpop.f32.mrb[125].mxu0 }
 0x1e0   : > { %v1572_v37 = vld [vmem:[#allocation2 + $0x38] sm:$0xff]  ;;  %v1479_v61 = vpop.f32.mrb[126].mxu0 }
 0x1e1   : > { %v1604_v19 = vmax.f32 %v1591_v11, 0.0  ;;  %1761 = vst.msk [vmem:[%s3251_s29 + $0x14] sm:$0xf] %vm1755_vm10, %v1994_v43  ;;  %v1592_v23 = vadd.f32 %v3231_v52, %v1572_v37  ;;  %v1496_v45 = vsel %vm1495_vm9, %v1493_v35, %v1494_v13  ;;  %v1508_v39 = vsel %vm1495_vm9, %v1494_v13, %v1482_v31  ;;  %v2343_v33 = vpop.f32.mrb[127].mxu0 }
 0x1e2   : > { %1558 = vst.msk [vmem:[#allocation2 + $0x48] sm:$0xff] %vm283_vm6, %v1544_v34  ;;  %v1519_v51 = vadd.f32 %v1496_v45, %v1386_v63  ;;  %v1520_v36 = vadd.f32 %v1508_v39, %v1387_v25  ;;  %v1682_v53 = vpop.permute.xlu1 %1681 }
 0x1e3   : > { %v1695_v55 = vmul.f32 %v3179_v6, %v1604_v19  ;;  %v1605_v26 = vmax.f32 %v1592_v23, 0.0 }
 0x1e4   : > { %v1545_v18 = vadd.f32 %v1532_v1, %v1519_v51  ;;  %v1546_v7 = vadd.f32 %v1533_v22, %v1520_v36 }
 0x1e5   : > { %v1995_v40 = vpack.c.bf16 %v1695_v55, %v1695_v55  ;;  %v1696_v20 = vmul.f32 %v1662_v57, %v1605_v26  ;;  %v1573_v27 = vld [vmem:[#allocation2 + $0x40] sm:$0xff] }
 0x1e6   : > { %1559 = vst.msk [vmem:[#allocation2 + $0x50] sm:$0xff] %vm283_vm6, %v1545_v18  ;;  %1560 = vst.msk [vmem:[#allocation2 + $0x58] sm:$0xff] %vm283_vm6, %v1546_v7  ;;  %v1593_v41 = vadd.f32 %v3231_v52, %v1573_v27 }
 0x1e7   : > { %1762 = vst.msk [vmem:[%s3251_s29 + $0x18] sm:$0xf] %vm1755_vm10, %v1995_v40  ;;  %v1996_v15 = vpack.c.bf16 %v1696_v20, %v1696_v20 }
 0x1e8   : > { %v1606_v56 = vmax.f32 %v1593_v41, 0.0 }
 0x1e9   : > { %v1574_v6 = vld [vmem:[#allocation2 + $0x48] sm:$0xff]  ;;  %1763 = vst.msk [vmem:[%s3251_s29 + $0x1c] sm:$0xf] %vm1755_vm10, %v1996_v15 }
 0x1ea   : > { %v1594_v31 = vadd.f32 %v3231_v52, %v1574_v6  ;;  %v1697_v30 = vmul.f32 %v3201_v54, %v1606_v56 }
 0x1ec   : > { %v1607_v59 = vmax.f32 %v1594_v31, 0.0  ;;  %v1997_v44 = vpack.c.bf16 %v1697_v30, %v1697_v30 }
 0x1ed   : > { %v1575_v24 = vld [vmem:[#allocation2 + $0x50] sm:$0xff]  ;;  %v1576_v9 = vld [vmem:[#allocation2 + $0x58] sm:$0xff] }
 0x1ee   : > { %v1698_v46 = vmul.f32 %v1672_v2, %v1607_v59  ;;  %v1595_v5 = vadd.f32 %v3231_v52, %v1575_v24  ;;  %v1596_v10 = vadd.f32 %v3231_v52, %v1576_v9  ;;  %1764 = vst.msk [vmem:[%s3251_s29 + $0x20] sm:$0xf] %vm1755_vm10, %v1997_v44 }
 0x1f0   : > { %v1998_v3 = vpack.c.bf16 %v1698_v46, %v1698_v46  ;;  %v1608_v58 = vmax.f32 %v1595_v5, 0.0  ;;  %v1609_v35 = vmax.f32 %v1596_v10, 0.0 }
 0x1f2   : > { %1765 = vst.msk [vmem:[%s3251_s29 + $0x24] sm:$0xf] %vm1755_vm10, %v1998_v3  ;;  %v1699_v54 = vmul.f32 %v3215_v49, %v1608_v58  ;;  %v1700_v16 = vmul.f32 %v1682_v53, %v1609_v35 }
 0x1f4   : > { %v1999_v0 = vpack.c.bf16 %v1699_v54, %v1699_v54  ;;  %v2000_v12 = vpack.c.bf16 %v1700_v16, %v1700_v16 }
 0x1f6   : > { %1766 = vst.msk [vmem:[%s3251_s29 + $0x28] sm:$0xf] %vm1755_vm10, %v1999_v0  ;;  %1767 = vst.msk [vmem:[%s3251_s29 + $0x2c] sm:$0xf] %vm1755_vm10, %v2000_v12 }
 0x1f7 PF: > { %s14_s17 = sadd.s32 1, %s2405_s17   ;;  %s3359_s15 = smov %s2401_s16 }
 0x1f8   : > { %p11_p5 = scmp.ge.s32.totalorder %s14_s17, 4   ;;  %s3360_s16 = smov %s3362_s18 }
 0x1fa   :  { %13 = sbr.rel (!%p11_p5) target bundleno = 2 (0x2), region = 88 }

</bundles_post_ra>
